<compile_context>
chip_gen: v6e
topology: v6e:2x2x1
jax: 0.10.0
libtpu: 0.0.40
codegen_flags: <defaults>
</compile_context>

<pallas_src>
import math
from functools import partial

import jax
import jax.numpy as jnp
from jax.experimental import pallas as pl
from jax.experimental.pallas import tpu as pltpu

NUM_BINS = 255


def _silu(x):
    return x * jax.nn.sigmoid(x)


def _round_up(x, m):
    return ((x + m - 1) // m) * m


def _device_info():
    """(num_tensorcores, activation VMEM budget, vmem_limit_bytes or None)."""
    try:
        kind = jax.devices()[0].device_kind.lower()
    except Exception:  # pragma: no cover - defensive
        kind = ""
    if "v7" in kind:                       # 2 TCs, 64 MiB physical VMEM per TC
        return 2, 20 * 2**20, 48 * 2**20
    if "v5" in kind or "v6" in kind:       # 1 TC, 128 MiB physical VMEM
        return 1, 48 * 2**20, 96 * 2**20
    return 1, 12 * 2**20, None             # unknown chip: stay conservative


def _pick_block_b(B, T, num_tc, est_fn, vmem_budget, max_rows=1024):
    """Batch elements per grid step (rows per step = Bb*T)."""
    bb = B if num_tc <= 1 else max(1, -(-B // num_tc))
    bb = max(1, min(bb, max(1, max_rows // max(T, 1))))
    while bb > 1 and est_fn(bb) > vmem_budget:
        bb = (bb + 1) // 2
    if num_tc > 1 and B > 1:
        g = -(-B // bb)
        g_even = -(-g // num_tc) * num_tc  # keep grid a multiple of the TC count
        bb = max(1, -(-B // g_even))
    return bb, -(-B // bb)


def _reward_head_kernel(num_heads, md,
                        h_ref, code_ref,
                        wsp_ref, bsp_ref,
                        wcode_ref, bcode_ref,
                        wq_sp_ref,
                        wo_ref, bo_ref,
                        w1_ref, b1_ref,
                        w2_ref, b2_ref,
                        wbs_ref, bbs_ref,
                        binc_ref,
                        out_ref):
    Bb, T, Dw = h_ref.shape
    Dc = code_ref.shape[-1]
    E = 2 * Dc
    Ep = wcode_ref.shape[-1] // 3          # 128-aligned width of each sub-block
    NBp = binc_ref.shape[-1]               # padded bin count (256)
    M = Bb * T
    hd = E // num_heads
    inv_sqrt = 1.0 / math.sqrt(hd)

    # Flatten (Bb, T) -> M rows so every linear layer runs with a large M.
    h2 = h_ref[...].reshape(M, Dw)
    code2 = code_ref[...].reshape(M, Dc)

    def mm(x, w):
        # MXU operands in `md` (bf16 by default), f32 accumulation.
        return jnp.dot(x.astype(md), w, preferred_element_type=jnp.float32)

    # --- state_proj (SiLU) ----------------------------------------------------
    sp = _silu(mm(h2, wsp_ref[...]) + bsp_ref[...])            # [M, Dc]

    # --- fused code projections: [ k (code_align folded) | v | q_code ] ------
    # Each sub-block padded to a 128-lane boundary so slices start vreg-aligned.
    cy = mm(code2, wcode_ref[...]) + bcode_ref[...]            # [M, 3*Ep]
    k = cy[:, :E]
    v = cy[:, Ep:Ep + E]
    q = cy[:, 2 * Ep:2 * Ep + E] + mm(sp, wq_sp_ref[...])      # query concat eliminated

    # Cast once for bf16 MXU attention; VPU/EUP softmax math stays f32.
    q3 = q.astype(md).reshape(Bb, T, E)
    k3 = k.astype(md).reshape(Bb, T, E)
    v3 = v.astype(md).reshape(Bb, T, E)

    # --- multi-head attention over T, batched over Bb ------------------------
    ctx_parts = []
    for i in range(num_heads):             # static unroll; rank-3 einsums
        lo = i * hd
        qi = q3[:, :, lo:lo + hd]
        ki = k3[:, :, lo:lo + hd]
        vi = v3[:, :, lo:lo + hd]
        s = jnp.einsum('bqd,bkd->bqk', qi, ki,
                       preferred_element_type=jnp.float32) * inv_sqrt
        s = s - jnp.max(s, axis=-1, keepdims=True)
        p = jnp.exp(s)
        l = jnp.sum(p, axis=-1, keepdims=True)                 # [Bb, T, 1]
        ctx_u = jnp.einsum('bqk,bkd->bqd', p.astype(md), vi,
                           preferred_element_type=jnp.float32)
        # normalize after p@v (Txhd instead of TxT work)
        ctx_parts.append(ctx_u * pl.reciprocal(l, approx=True))
    ctx = jnp.concatenate(ctx_parts, axis=-1).reshape(M, E)
    # TODO(synk): heads-in-batch contraction would merge the per-head MXU/XLU
    # work but needs multi-batch dot_general support; kept per-head for safety.

    attn_out = mm(ctx, wo_ref[...]) + bo_ref[...]              # [M, E]

    # --- mlp + fused expectation over (padded) bins ---------------------------
    hid = _silu(mm(attn_out, w1_ref[...]) + b1_ref[...])       # [M, hidden]
    logits = mm(hid, w2_ref[...]) + b2_ref[...]                # pad bias = -1e30 (f32)
    logits = logits - jnp.max(logits, axis=-1, keepdims=True)
    e = jnp.exp(logits)                                        # [M, NBp]

    # bin_scaler computed late -> short live range for the [M, NBp] scale slab
    scale = jax.nn.sigmoid(mm(h2, wbs_ref[...]) + bbs_ref[...])  # [M, NBp]

    weighted = e * (binc_ref[...] * scale)                     # [M, NBp]
    num = jnp.sum(weighted.reshape(Bb, T, NBp), axis=-1)       # [Bb, T]
    den = jnp.sum(e.reshape(Bb, T, NBp), axis=-1)              # [Bb, T]
    out_ref[0] = num * pl.reciprocal(den, approx=True)         # [Bb, T]


def fuse_params(params, matmul_dtype=jnp.bfloat16):
    """Host-side weight folding / fusion / padding (exact linear algebra).

    Call once and reuse; weights are cast to `matmul_dtype`, biases stay f32.
    """
    Dc = params["wca"].shape[0]
    E = 2 * Dc
    Ep = _round_up(E, 128)
    NB = params["binc"].shape[-1]
    NBp = _round_up(NB, 128)               # 255 -> 256
    padb = NBp - NB

    # Pad the bin axis: padded logit bias -1e30 => exactly zero softmax mass,
    # padded bin center 0 => zero contribution to the expectation.
    w2p = jnp.pad(params["w2"], ((0, 0), (0, padb)))
    b2p = jnp.pad(params["b2"], ((0, 0), (0, padb)), constant_values=-1e30)
    wbsp = jnp.pad(params["wbs"], ((0, 0), (0, padb)))
    bbsp = jnp.pad(params["bbs"], ((0, 0), (0, padb)))
    bincp = jnp.pad(params["binc"], ((0, 0), (0, padb)))

    def pad_e(w):                          # pad cols E -> Ep (vreg-aligned slices)
        return jnp.pad(w, ((0, 0), (0, Ep - E)))

    # Fold code_align (bias-free by construction) into the key projection,
    # split wq into its state_proj / code halves, fuse all code-consuming
    # projections into one matmul with 128-aligned sub-blocks.
    wk_fused = params["wca"] @ params["wk"]
    wq_sp, wq_code = params["wq"][:Dc], params["wq"][Dc:]
    w_code = jnp.concatenate([pad_e(wk_fused), pad_e(params["wv"]), pad_e(wq_code)], axis=1)
    b_code = jnp.concatenate([pad_e(params["bk"]), pad_e(params["bv"]), pad_e(params["bq"])], axis=1)

    md = matmul_dtype
    return {
        "wsp": params["wsp"].astype(md), "bsp": params["bsp"],
        "w_code": w_code.astype(md), "b_code": b_code,
        "wq_sp": wq_sp.astype(md),
        "wo": params["wo"].astype(md), "bo": params["bo"],
        "w1": params["w1"].astype(md), "b1": params["b1"],
        "w2": w2p.astype(md), "b2": b2p,                 # biases stay f32
        "wbs": wbsp.astype(md), "bbs": bbsp,
        "binc": bincp,
    }


def improved_reward_head(h_modulated, code_emb, q_re, fused, num_heads=4):
    """h_modulated: [B,T,Dw], code_emb: [B,T,Dc], q_re: [B,T,K] (unused).

    `fused` comes from fuse_params(); call that once and reuse (weight prep is
    hoisted out of the per-call path).
    """
    del q_re  # not used by ImprovedRewardHead.forward
    B, T, Dw = h_modulated.shape
    Dc = code_emb.shape[-1]
    E = 2 * Dc
    assert E % num_heads == 0
    Ep = fused["w_code"].shape[-1] // 3
    NBp = fused["binc"].shape[-1]
    hidden = fused["w1"].shape[-1]
    md = fused["wsp"].dtype

    num_tc, act_budget, vmem_limit = _device_info()

    def est_vmem(bb):                      # rough f32 live-activation footprint
        m = bb * T
        cols = Dw + Dc + 3 * Ep + 4 * E + hidden + 3 * NBp
        return 4 * (m * cols + bb * T * T * 3 + 2 * bb * T * (Dw + Dc) + 4 * m)

    Bb, G = _pick_block_b(B, T, num_tc, est_vmem, act_budget)

    # Non-divisor / prime B: pad the batch; padded rows are sliced off below.
    Bpad = G * Bb
    if Bpad != B:
        bp = ((0, Bpad - B), (0, 0), (0, 0))
        h_modulated = jnp.pad(h_modulated, bp)
        code_emb = jnp.pad(code_emb, bp)

    order = ["wsp", "bsp", "w_code", "b_code", "wq_sp", "wo", "bo",
             "w1", "b1", "w2", "b2", "wbs", "bbs", "binc"]
    weights = [fused[k] for k in order]

    in_specs = [
        pl.BlockSpec((Bb, T, Dw), lambda b: (b, 0, 0)),
        pl.BlockSpec((Bb, T, Dc), lambda b: (b, 0, 0)),
    ] + [
        # small weights stay fully resident in VMEM for every grid step
        pl.BlockSpec(w.shape, lambda b, n=w.ndim: (0,) * n) for w in weights
    ]

    out3 = pl.pallas_call(
        partial(_reward_head_kernel, num_heads, md),
        out_shape=jax.ShapeDtypeStruct((G, Bb, T), jnp.float32),
        grid_spec=pltpu.PrefetchScalarGridSpec(
            num_scalar_prefetch=0,
            grid=(G,),
            in_specs=in_specs,
            out_specs=pl.BlockSpec((1, Bb, T), lambda b: (b, 0, 0)),
        ),
        compiler_params=pltpu.CompilerParams(
            dimension_semantics=("parallel",),
            vmem_limit_bytes=vmem_limit,
        ),
    )(h_modulated, code_emb, *weights)
    return out3.reshape(Bpad, T)[:B]


def init_params(key, num_codes, code_dim, hidden_state_dim,
                num_heads=4, hidden_dim=256):
    del num_codes  # scale_proj (parent class) is unused by this forward
    E = 2 * code_dim
    ks = iter(jax.random.split(key, 32))

    def lin_w(k, fan_in, fan_out):
        bound = 1.0 / math.sqrt(fan_in)
        return jax.random.uniform(k, (fan_in, fan_out), jnp.float32, -bound, bound)

    def lin_b(k, fan_in, fan_out):
        bound = 1.0 / math.sqrt(fan_in)
        return jax.random.uniform(k, (1, fan_out), jnp.float32, -bound, bound)

    # orthogonal init for code_align (matches nn.init.orthogonal_)
    a = jax.random.normal(next(ks), (code_dim, code_dim), jnp.float32)
    q_mat, r_mat = jnp.linalg.qr(a)
    wca = q_mat * jnp.sign(jnp.diag(r_mat))[None, :]

    return {
        "wsp": lin_w(next(ks), hidden_state_dim, code_dim),
        "bsp": lin_b(next(ks), hidden_state_dim, code_dim),
        "wca": wca,
        "wq": lin_w(next(ks), E, E),  "bq": lin_b(next(ks), E, E),
        "wk": lin_w(next(ks), code_dim, E), "bk": lin_b(next(ks), code_dim, E),
        "wv": lin_w(next(ks), code_dim, E), "bv": lin_b(next(ks), code_dim, E),
        "wo": lin_w(next(ks), E, E),  "bo": lin_b(next(ks), E, E),
        # mlp first Linear takes the 2*code_dim attention output (see TODO above)
        "w1": lin_w(next(ks), E, hidden_dim), "b1": lin_b(next(ks), E, hidden_dim),
        "w2": lin_w(next(ks), hidden_dim, NUM_BINS), "b2": lin_b(next(ks), hidden_dim, NUM_BINS),
        "wbs": lin_w(next(ks), hidden_state_dim, NUM_BINS),
        "bbs": lin_b(next(ks), hidden_state_dim, NUM_BINS),
        "binc": jnp.linspace(-10.0, 10.0, NUM_BINS, dtype=jnp.float32).reshape(1, NUM_BINS),
    }


def _reference_forward(h, code, params, num_heads):
    """Pure-JAX (non-Pallas) forward used only for a correctness check."""
    sp = jax.nn.silu(h @ params["wsp"] + params["bsp"])
    query = jnp.concatenate([sp, code], axis=-1)
    q = query @ params["wq"] + params["bq"]
    k = (code @ params["wca"]) @ params["wk"] + params["bk"]
    v = code @ params["wv"] + params["bv"]
    B, T, E = q.shape
    hd = E // num_heads

    def split(x):
        return x.reshape(B, T, num_heads, hd).transpose(0, 2, 1, 3)

    qh, kh, vh = split(q), split(k), split(v)
    s = jnp.einsum('bhqd,bhkd->bhqk', qh, kh) / math.sqrt(hd)
    p = jax.nn.softmax(s, axis=-1)
    ctx = jnp.einsum('bhqk,bhkd->bhqd', p, vh).transpose(0, 2, 1, 3).reshape(B, T, E)
    attn_out = ctx @ params["wo"] + params["bo"]
    hid = jax.nn.silu(attn_out @ params["w1"] + params["b1"])
    logits = hid @ params["w2"] + params["b2"]
    scale = jax.nn.sigmoid(h @ params["wbs"] + params["bbs"])
    scaled_bins = params["binc"] * scale
    return jnp.sum(jax.nn.softmax(logits, axis=-1) * scaled_bins, axis=-1)


if __name__ == "__main__":
    key = jax.random.PRNGKey(0)
    B, T = 2, 8
    num_codes, code_dim, hidden_state_dim, num_heads = 8, 32, 32, 4

    kp, kh, kc, kq = jax.random.split(key, 4)
    params = init_params(kp, num_codes, code_dim, hidden_state_dim, num_heads)

    h_modulated = jax.random.normal(kh, (B, T, hidden_state_dim), jnp.float32)
    code_emb = jax.random.normal(kc, (B, T, code_dim), jnp.float32)
    q_re = jax.nn.softmax(
        jax.random.normal(kq, (B, T, num_codes), jnp.float32), axis=-1)

    ref = _reference_forward(h_modulated, code_emb, params, num_heads)
    fwd = jax.jit(partial(improved_reward_head, num_heads=num_heads))

    # f32 MXU operands: strict parity with the pure-JAX reference.
    fused_f32 = fuse_params(params, matmul_dtype=jnp.float32)
    out_f32 = jax.block_until_ready(fwd(h_modulated, code_emb, q_re, fused_f32))
    assert out_f32.shape == (B, T) and out_f32.dtype == jnp.float32
    assert bool(jnp.all(jnp.isfinite(out_f32)))
    err_f32 = float(jnp.max(jnp.abs(out_f32 - ref)))
    assert err_f32 < 2e-2, f"f32 kernel/reference mismatch: max_err={err_f32}"

    # bf16 MXU operands (default / recommended on v5e+): sanity + loose parity.
    fused_bf16 = fuse_params(params, matmul_dtype=jnp.bfloat16)
    out_bf16 = jax.block_until_ready(fwd(h_modulated, code_emb, q_re, fused_bf16))
    assert out_bf16.shape == (B, T)
    assert bool(jnp.all(jnp.isfinite(out_bf16)))
    err_bf16 = float(jnp.max(jnp.abs(out_bf16 - ref)))
    assert err_bf16 < 0.5, f"bf16 kernel/reference mismatch: max_err={err_bf16}"

    print("KERNEL_OK")
</pallas_src>

<mosaic_0001>
module attributes {stable_mosaic.version = 11 : i64} {
  func.func @_reward_head_kernel(%arg0: i32, %arg1: memref<2x8x32xf32, #tpu.memory_space<vmem>>, %arg2: memref<2x8x32xf32, #tpu.memory_space<vmem>>, %arg3: memref<32x32xf32, #tpu.memory_space<vmem>>, %arg4: memref<1x32xf32, #tpu.memory_space<vmem>>, %arg5: memref<32x384xf32, #tpu.memory_space<vmem>>, %arg6: memref<1x384xf32, #tpu.memory_space<vmem>>, %arg7: memref<32x64xf32, #tpu.memory_space<vmem>>, %arg8: memref<64x64xf32, #tpu.memory_space<vmem>>, %arg9: memref<1x64xf32, #tpu.memory_space<vmem>>, %arg10: memref<64x256xf32, #tpu.memory_space<vmem>>, %arg11: memref<1x256xf32, #tpu.memory_space<vmem>>, %arg12: memref<256x256xf32, #tpu.memory_space<vmem>>, %arg13: memref<1x256xf32, #tpu.memory_space<vmem>>, %arg14: memref<32x256xf32, #tpu.memory_space<vmem>>, %arg15: memref<1x256xf32, #tpu.memory_space<vmem>>, %arg16: memref<1x256xf32, #tpu.memory_space<vmem>>, %arg17: memref<1x2x8xf32, #tpu.memory_space<vmem>>) attributes {dimension_semantics = [#tpu.dimension_semantics<parallel>], iteration_bounds = array<i64: 1>, scalar_prefetch = 0 : i64, scratch_operands = 0 : i64, tpu.core_type = #tpu.core_type<tc>, window_params = [{transform_indices = @transform_0, window_bounds = array<i64: 2, 8, 32>}, {transform_indices = @transform_1, window_bounds = array<i64: 2, 8, 32>}, {pipeline_mode = #tpu.pipeline_mode<synchronous>, transform_indices = @transform_2, window_bounds = array<i64: 32, 32>}, {pipeline_mode = #tpu.pipeline_mode<synchronous>, transform_indices = @transform_3, window_bounds = array<i64: 1, 32>}, {pipeline_mode = #tpu.pipeline_mode<synchronous>, transform_indices = @transform_4, window_bounds = array<i64: 32, 384>}, {pipeline_mode = #tpu.pipeline_mode<synchronous>, transform_indices = @transform_5, window_bounds = array<i64: 1, 384>}, {pipeline_mode = #tpu.pipeline_mode<synchronous>, transform_indices = @transform_6, window_bounds = array<i64: 32, 64>}, {pipeline_mode = #tpu.pipeline_mode<synchronous>, transform_indices = @transform_7, window_bounds = array<i64: 64, 64>}, {pipeline_mode = #tpu.pipeline_mode<synchronous>, transform_indices = @transform_8, window_bounds = array<i64: 1, 64>}, {pipeline_mode = #tpu.pipeline_mode<synchronous>, transform_indices = @transform_9, window_bounds = array<i64: 64, 256>}, {pipeline_mode = #tpu.pipeline_mode<synchronous>, transform_indices = @transform_10, window_bounds = array<i64: 1, 256>}, {pipeline_mode = #tpu.pipeline_mode<synchronous>, transform_indices = @transform_11, window_bounds = array<i64: 256, 256>}, {pipeline_mode = #tpu.pipeline_mode<synchronous>, transform_indices = @transform_12, window_bounds = array<i64: 1, 256>}, {pipeline_mode = #tpu.pipeline_mode<synchronous>, transform_indices = @transform_13, window_bounds = array<i64: 32, 256>}, {pipeline_mode = #tpu.pipeline_mode<synchronous>, transform_indices = @transform_14, window_bounds = array<i64: 1, 256>}, {pipeline_mode = #tpu.pipeline_mode<synchronous>, transform_indices = @transform_15, window_bounds = array<i64: 1, 256>}, {transform_indices = @transform_16, window_bounds = array<i64: 1, 2, 8>}]} {
    %c0 = arith.constant 0 : index
    %c0_0 = arith.constant 0 : index
    %c0_1 = arith.constant 0 : index
    %0 = vector.load %arg1[%c0, %c0_0, %c0_1] : memref<2x8x32xf32, #tpu.memory_space<vmem>>, vector<2x8x32xf32>
    %1 = vector.shape_cast %0 : vector<2x8x32xf32> to vector<16x32xf32>
    %c0_2 = arith.constant 0 : index
    %c0_3 = arith.constant 0 : index
    %c0_4 = arith.constant 0 : index
    %2 = vector.load %arg2[%c0_2, %c0_3, %c0_4] : memref<2x8x32xf32, #tpu.memory_space<vmem>>, vector<2x8x32xf32>
    %3 = vector.shape_cast %2 : vector<2x8x32xf32> to vector<16x32xf32>
    %c0_5 = arith.constant 0 : index
    %c0_6 = arith.constant 0 : index
    %4 = vector.load %arg3[%c0_5, %c0_6] : memref<32x32xf32, #tpu.memory_space<vmem>>, vector<32x32xf32>
    %cst = arith.constant dense<0.000000e+00> : vector<16x32xf32>
    %5 = tpu.matmul %1, %4, %cst {dimension_numbers = #tpu.dot_dimension_numbers<[1], [0], [0], [1], [0, 0, 1, 1], [], []>} : vector<16x32xf32>, vector<32x32xf32>, vector<16x32xf32> -> vector<16x32xf32>
    %c0_7 = arith.constant 0 : index
    %c0_8 = arith.constant 0 : index
    %6 = vector.load %arg4[%c0_7, %c0_8] : memref<1x32xf32, #tpu.memory_space<vmem>>, vector<1x32xf32>
    %7 = vector.broadcast %6 : vector<1x32xf32> to vector<16x32xf32>
    %8 = arith.addf %5, %7 : vector<16x32xf32>
    %9 = arith.negf %8 : vector<16x32xf32>
    %10 = math.exp %9 : vector<16x32xf32>
    %cst_9 = arith.constant 1.000000e+00 : f32
    %11 = vector.broadcast %cst_9 : f32 to vector<16x32xf32>
    %12 = arith.addf %11, %10 : vector<16x32xf32>
    %13 = arith.divf %11, %12 : vector<16x32xf32>
    %14 = arith.mulf %8, %13 : vector<16x32xf32>
    %c0_10 = arith.constant 0 : index
    %c0_11 = arith.constant 0 : index
    %15 = vector.load %arg5[%c0_10, %c0_11] : memref<32x384xf32, #tpu.memory_space<vmem>>, vector<32x384xf32>
    %cst_12 = arith.constant dense<0.000000e+00> : vector<16x384xf32>
    %16 = tpu.matmul %3, %15, %cst_12 {dimension_numbers = #tpu.dot_dimension_numbers<[1], [0], [0], [1], [0, 0, 1, 1], [], []>} : vector<16x32xf32>, vector<32x384xf32>, vector<16x384xf32> -> vector<16x384xf32>
    %c0_13 = arith.constant 0 : index
    %c0_14 = arith.constant 0 : index
    %17 = vector.load %arg6[%c0_13, %c0_14] : memref<1x384xf32, #tpu.memory_space<vmem>>, vector<1x384xf32>
    %18 = vector.broadcast %17 : vector<1x384xf32> to vector<16x384xf32>
    %19 = arith.addf %16, %18 : vector<16x384xf32>
    %20 = vector.extract_strided_slice %19 {offsets = [0, 0], sizes = [16, 64], strides = [1, 1]} : vector<16x384xf32> to vector<16x64xf32>
    %21 = vector.extract_strided_slice %19 {offsets = [0, 128], sizes = [16, 64], strides = [1, 1]} : vector<16x384xf32> to vector<16x64xf32>
    %22 = vector.extract_strided_slice %19 {offsets = [0, 256], sizes = [16, 64], strides = [1, 1]} : vector<16x384xf32> to vector<16x64xf32>
    %c0_15 = arith.constant 0 : index
    %c0_16 = arith.constant 0 : index
    %23 = vector.load %arg7[%c0_15, %c0_16] : memref<32x64xf32, #tpu.memory_space<vmem>>, vector<32x64xf32>
    %cst_17 = arith.constant dense<0.000000e+00> : vector<16x64xf32>
    %24 = tpu.matmul %14, %23, %cst_17 {dimension_numbers = #tpu.dot_dimension_numbers<[1], [0], [0], [1], [0, 0, 1, 1], [], []>} : vector<16x32xf32>, vector<32x64xf32>, vector<16x64xf32> -> vector<16x64xf32>
    %25 = arith.addf %22, %24 : vector<16x64xf32>
    %26 = vector.shape_cast %25 : vector<16x64xf32> to vector<2x8x64xf32>
    %27 = vector.shape_cast %20 : vector<16x64xf32> to vector<2x8x64xf32>
    %28 = vector.shape_cast %21 : vector<16x64xf32> to vector<2x8x64xf32>
    %29 = vector.extract_strided_slice %26 {offsets = [0, 0, 0], sizes = [2, 8, 16], strides = [1, 1, 1]} : vector<2x8x64xf32> to vector<2x8x16xf32>
    %30 = vector.extract_strided_slice %27 {offsets = [0, 0, 0], sizes = [2, 8, 16], strides = [1, 1, 1]} : vector<2x8x64xf32> to vector<2x8x16xf32>
    %31 = vector.extract_strided_slice %28 {offsets = [0, 0, 0], sizes = [2, 8, 16], strides = [1, 1, 1]} : vector<2x8x64xf32> to vector<2x8x16xf32>
    "tpu.trace_start"() <{level = 10 : i32, message = "bqd,bkd->bqk"}> : () -> ()
    %cst_18 = arith.constant dense<0.000000e+00> : vector<2x8x8xf32>
    %32 = tpu.matmul %29, %30, %cst_18 {dimension_numbers = #tpu.dot_dimension_numbers<[2], [2], [1], [1], [0, 0, 0, 1, 1, 1], [0], [0]>} : vector<2x8x16xf32>, vector<2x8x16xf32>, vector<2x8x8xf32> -> vector<2x8x8xf32>
    "tpu.trace_stop"() : () -> ()
    %cst_19 = arith.constant 2.500000e-01 : f32
    %33 = vector.broadcast %cst_19 : f32 to vector<2x8x8xf32>
    %34 = arith.mulf %32, %33 : vector<2x8x8xf32>
    %cst_20 = arith.constant dense<0xFF800000> : vector<2x8xf32>
    %35 = vector.multi_reduction <maximumf>, %34, %cst_20 [2] : vector<2x8x8xf32> to vector<2x8xf32>
    %36 = vector.shape_cast %35 : vector<2x8xf32> to vector<2x8x1xf32>
    %37 = vector.broadcast %36 : vector<2x8x1xf32> to vector<2x8x8xf32>
    %38 = arith.subf %34, %37 : vector<2x8x8xf32>
    %39 = math.exp %38 : vector<2x8x8xf32>
    %cst_21 = arith.constant dense<0.000000e+00> : vector<2x8xf32>
    %40 = vector.multi_reduction <add>, %39, %cst_21 [2] : vector<2x8x8xf32> to vector<2x8xf32>
    %41 = vector.shape_cast %40 : vector<2x8xf32> to vector<2x8x1xf32>
    "tpu.trace_start"() <{level = 10 : i32, message = "bqk,bkd->bqd"}> : () -> ()
    %cst_22 = arith.constant dense<0.000000e+00> : vector<2x8x16xf32>
    %42 = tpu.matmul %39, %31, %cst_22 {dimension_numbers = #tpu.dot_dimension_numbers<[2], [1], [1], [2], [0, 0, 0, 1, 1, 2], [0], [0]>} : vector<2x8x8xf32>, vector<2x8x16xf32>, vector<2x8x16xf32> -> vector<2x8x16xf32>
    "tpu.trace_stop"() : () -> ()
    %43 = tpu.reciprocal %41 {approx = true} : vector<2x8x1xf32> -> vector<2x8x1xf32>
    %44 = vector.broadcast %43 : vector<2x8x1xf32> to vector<2x8x16xf32>
    %45 = arith.mulf %42, %44 : vector<2x8x16xf32>
    %46 = vector.extract_strided_slice %26 {offsets = [0, 0, 16], sizes = [2, 8, 16], strides = [1, 1, 1]} : vector<2x8x64xf32> to vector<2x8x16xf32>
    %47 = vector.extract_strided_slice %27 {offsets = [0, 0, 16], sizes = [2, 8, 16], strides = [1, 1, 1]} : vector<2x8x64xf32> to vector<2x8x16xf32>
    %48 = vector.extract_strided_slice %28 {offsets = [0, 0, 16], sizes = [2, 8, 16], strides = [1, 1, 1]} : vector<2x8x64xf32> to vector<2x8x16xf32>
    "tpu.trace_start"() <{level = 10 : i32, message = "bqd,bkd->bqk"}> : () -> ()
    %cst_23 = arith.constant dense<0.000000e+00> : vector<2x8x8xf32>
    %49 = tpu.matmul %46, %47, %cst_23 {dimension_numbers = #tpu.dot_dimension_numbers<[2], [2], [1], [1], [0, 0, 0, 1, 1, 1], [0], [0]>} : vector<2x8x16xf32>, vector<2x8x16xf32>, vector<2x8x8xf32> -> vector<2x8x8xf32>
    "tpu.trace_stop"() : () -> ()
    %cst_24 = arith.constant 2.500000e-01 : f32
    %50 = vector.broadcast %cst_24 : f32 to vector<2x8x8xf32>
    %51 = arith.mulf %49, %50 : vector<2x8x8xf32>
    %cst_25 = arith.constant dense<0xFF800000> : vector<2x8xf32>
    %52 = vector.multi_reduction <maximumf>, %51, %cst_25 [2] : vector<2x8x8xf32> to vector<2x8xf32>
    %53 = vector.shape_cast %52 : vector<2x8xf32> to vector<2x8x1xf32>
    %54 = vector.broadcast %53 : vector<2x8x1xf32> to vector<2x8x8xf32>
    %55 = arith.subf %51, %54 : vector<2x8x8xf32>
    %56 = math.exp %55 : vector<2x8x8xf32>
    %cst_26 = arith.constant dense<0.000000e+00> : vector<2x8xf32>
    %57 = vector.multi_reduction <add>, %56, %cst_26 [2] : vector<2x8x8xf32> to vector<2x8xf32>
    %58 = vector.shape_cast %57 : vector<2x8xf32> to vector<2x8x1xf32>
    "tpu.trace_start"() <{level = 10 : i32, message = "bqk,bkd->bqd"}> : () -> ()
    %cst_27 = arith.constant dense<0.000000e+00> : vector<2x8x16xf32>
    %59 = tpu.matmul %56, %48, %cst_27 {dimension_numbers = #tpu.dot_dimension_numbers<[2], [1], [1], [2], [0, 0, 0, 1, 1, 2], [0], [0]>} : vector<2x8x8xf32>, vector<2x8x16xf32>, vector<2x8x16xf32> -> vector<2x8x16xf32>
    "tpu.trace_stop"() : () -> ()
    %60 = tpu.reciprocal %58 {approx = true} : vector<2x8x1xf32> -> vector<2x8x1xf32>
    %61 = vector.broadcast %60 : vector<2x8x1xf32> to vector<2x8x16xf32>
    %62 = arith.mulf %59, %61 : vector<2x8x16xf32>
    %63 = vector.extract_strided_slice %26 {offsets = [0, 0, 32], sizes = [2, 8, 16], strides = [1, 1, 1]} : vector<2x8x64xf32> to vector<2x8x16xf32>
    %64 = vector.extract_strided_slice %27 {offsets = [0, 0, 32], sizes = [2, 8, 16], strides = [1, 1, 1]} : vector<2x8x64xf32> to vector<2x8x16xf32>
    %65 = vector.extract_strided_slice %28 {offsets = [0, 0, 32], sizes = [2, 8, 16], strides = [1, 1, 1]} : vector<2x8x64xf32> to vector<2x8x16xf32>
    "tpu.trace_start"() <{level = 10 : i32, message = "bqd,bkd->bqk"}> : () -> ()
    %cst_28 = arith.constant dense<0.000000e+00> : vector<2x8x8xf32>
    %66 = tpu.matmul %63, %64, %cst_28 {dimension_numbers = #tpu.dot_dimension_numbers<[2], [2], [1], [1], [0, 0, 0, 1, 1, 1], [0], [0]>} : vector<2x8x16xf32>, vector<2x8x16xf32>, vector<2x8x8xf32> -> vector<2x8x8xf32>
    "tpu.trace_stop"() : () -> ()
    %cst_29 = arith.constant 2.500000e-01 : f32
    %67 = vector.broadcast %cst_29 : f32 to vector<2x8x8xf32>
    %68 = arith.mulf %66, %67 : vector<2x8x8xf32>
    %cst_30 = arith.constant dense<0xFF800000> : vector<2x8xf32>
    %69 = vector.multi_reduction <maximumf>, %68, %cst_30 [2] : vector<2x8x8xf32> to vector<2x8xf32>
    %70 = vector.shape_cast %69 : vector<2x8xf32> to vector<2x8x1xf32>
    %71 = vector.broadcast %70 : vector<2x8x1xf32> to vector<2x8x8xf32>
    %72 = arith.subf %68, %71 : vector<2x8x8xf32>
    %73 = math.exp %72 : vector<2x8x8xf32>
    %cst_31 = arith.constant dense<0.000000e+00> : vector<2x8xf32>
    %74 = vector.multi_reduction <add>, %73, %cst_31 [2] : vector<2x8x8xf32> to vector<2x8xf32>
    %75 = vector.shape_cast %74 : vector<2x8xf32> to vector<2x8x1xf32>
    "tpu.trace_start"() <{level = 10 : i32, message = "bqk,bkd->bqd"}> : () -> ()
    %cst_32 = arith.constant dense<0.000000e+00> : vector<2x8x16xf32>
    %76 = tpu.matmul %73, %65, %cst_32 {dimension_numbers = #tpu.dot_dimension_numbers<[2], [1], [1], [2], [0, 0, 0, 1, 1, 2], [0], [0]>} : vector<2x8x8xf32>, vector<2x8x16xf32>, vector<2x8x16xf32> -> vector<2x8x16xf32>
    "tpu.trace_stop"() : () -> ()
    %77 = tpu.reciprocal %75 {approx = true} : vector<2x8x1xf32> -> vector<2x8x1xf32>
    %78 = vector.broadcast %77 : vector<2x8x1xf32> to vector<2x8x16xf32>
    %79 = arith.mulf %76, %78 : vector<2x8x16xf32>
    %80 = vector.extract_strided_slice %26 {offsets = [0, 0, 48], sizes = [2, 8, 16], strides = [1, 1, 1]} : vector<2x8x64xf32> to vector<2x8x16xf32>
    %81 = vector.extract_strided_slice %27 {offsets = [0, 0, 48], sizes = [2, 8, 16], strides = [1, 1, 1]} : vector<2x8x64xf32> to vector<2x8x16xf32>
    %82 = vector.extract_strided_slice %28 {offsets = [0, 0, 48], sizes = [2, 8, 16], strides = [1, 1, 1]} : vector<2x8x64xf32> to vector<2x8x16xf32>
    "tpu.trace_start"() <{level = 10 : i32, message = "bqd,bkd->bqk"}> : () -> ()
    %cst_33 = arith.constant dense<0.000000e+00> : vector<2x8x8xf32>
    %83 = tpu.matmul %80, %81, %cst_33 {dimension_numbers = #tpu.dot_dimension_numbers<[2], [2], [1], [1], [0, 0, 0, 1, 1, 1], [0], [0]>} : vector<2x8x16xf32>, vector<2x8x16xf32>, vector<2x8x8xf32> -> vector<2x8x8xf32>
    "tpu.trace_stop"() : () -> ()
    %cst_34 = arith.constant 2.500000e-01 : f32
    %84 = vector.broadcast %cst_34 : f32 to vector<2x8x8xf32>
    %85 = arith.mulf %83, %84 : vector<2x8x8xf32>
    %cst_35 = arith.constant dense<0xFF800000> : vector<2x8xf32>
    %86 = vector.multi_reduction <maximumf>, %85, %cst_35 [2] : vector<2x8x8xf32> to vector<2x8xf32>
    %87 = vector.shape_cast %86 : vector<2x8xf32> to vector<2x8x1xf32>
    %88 = vector.broadcast %87 : vector<2x8x1xf32> to vector<2x8x8xf32>
    %89 = arith.subf %85, %88 : vector<2x8x8xf32>
    %90 = math.exp %89 : vector<2x8x8xf32>
    %cst_36 = arith.constant dense<0.000000e+00> : vector<2x8xf32>
    %91 = vector.multi_reduction <add>, %90, %cst_36 [2] : vector<2x8x8xf32> to vector<2x8xf32>
    %92 = vector.shape_cast %91 : vector<2x8xf32> to vector<2x8x1xf32>
    "tpu.trace_start"() <{level = 10 : i32, message = "bqk,bkd->bqd"}> : () -> ()
    %cst_37 = arith.constant dense<0.000000e+00> : vector<2x8x16xf32>
    %93 = tpu.matmul %90, %82, %cst_37 {dimension_numbers = #tpu.dot_dimension_numbers<[2], [1], [1], [2], [0, 0, 0, 1, 1, 2], [0], [0]>} : vector<2x8x8xf32>, vector<2x8x16xf32>, vector<2x8x16xf32> -> vector<2x8x16xf32>
    "tpu.trace_stop"() : () -> ()
    %94 = tpu.reciprocal %92 {approx = true} : vector<2x8x1xf32> -> vector<2x8x1xf32>
    %95 = vector.broadcast %94 : vector<2x8x1xf32> to vector<2x8x16xf32>
    %96 = arith.mulf %93, %95 : vector<2x8x16xf32>
    %97 = tpu.concatenate %45, %62, %79, %96 in 2 : vector<2x8x16xf32>, vector<2x8x16xf32>, vector<2x8x16xf32>, vector<2x8x16xf32> -> vector<2x8x64xf32>
    %98 = vector.shape_cast %97 : vector<2x8x64xf32> to vector<16x64xf32>
    %c0_38 = arith.constant 0 : index
    %c0_39 = arith.constant 0 : index
    %99 = vector.load %arg8[%c0_38, %c0_39] : memref<64x64xf32, #tpu.memory_space<vmem>>, vector<64x64xf32>
    %cst_40 = arith.constant dense<0.000000e+00> : vector<16x64xf32>
    %100 = tpu.matmul %98, %99, %cst_40 {dimension_numbers = #tpu.dot_dimension_numbers<[1], [0], [0], [1], [0, 0, 1, 1], [], []>} : vector<16x64xf32>, vector<64x64xf32>, vector<16x64xf32> -> vector<16x64xf32>
    %c0_41 = arith.constant 0 : index
    %c0_42 = arith.constant 0 : index
    %101 = vector.load %arg9[%c0_41, %c0_42] : memref<1x64xf32, #tpu.memory_space<vmem>>, vector<1x64xf32>
    %102 = vector.broadcast %101 : vector<1x64xf32> to vector<16x64xf32>
    %103 = arith.addf %100, %102 : vector<16x64xf32>
    %c0_43 = arith.constant 0 : index
    %c0_44 = arith.constant 0 : index
    %104 = vector.load %arg10[%c0_43, %c0_44] : memref<64x256xf32, #tpu.memory_space<vmem>>, vector<64x256xf32>
    %cst_45 = arith.constant dense<0.000000e+00> : vector<16x256xf32>
    %105 = tpu.matmul %103, %104, %cst_45 {dimension_numbers = #tpu.dot_dimension_numbers<[1], [0], [0], [1], [0, 0, 1, 1], [], []>} : vector<16x64xf32>, vector<64x256xf32>, vector<16x256xf32> -> vector<16x256xf32>
    %c0_46 = arith.constant 0 : index
    %c0_47 = arith.constant 0 : index
    %106 = vector.load %arg11[%c0_46, %c0_47] : memref<1x256xf32, #tpu.memory_space<vmem>>, vector<1x256xf32>
    %107 = vector.broadcast %106 : vector<1x256xf32> to vector<16x256xf32>
    %108 = arith.addf %105, %107 : vector<16x256xf32>
    %109 = arith.negf %108 : vector<16x256xf32>
    %110 = math.exp %109 : vector<16x256xf32>
    %cst_48 = arith.constant 1.000000e+00 : f32
    %111 = vector.broadcast %cst_48 : f32 to vector<16x256xf32>
    %112 = arith.addf %111, %110 : vector<16x256xf32>
    %113 = arith.divf %111, %112 : vector<16x256xf32>
    %114 = arith.mulf %108, %113 : vector<16x256xf32>
    %c0_49 = arith.constant 0 : index
    %c0_50 = arith.constant 0 : index
    %115 = vector.load %arg12[%c0_49, %c0_50] : memref<256x256xf32, #tpu.memory_space<vmem>>, vector<256x256xf32>
    %cst_51 = arith.constant dense<0.000000e+00> : vector<16x256xf32>
    %116 = tpu.matmul %114, %115, %cst_51 {dimension_numbers = #tpu.dot_dimension_numbers<[1], [0], [0], [1], [0, 0, 1, 1], [], []>} : vector<16x256xf32>, vector<256x256xf32>, vector<16x256xf32> -> vector<16x256xf32>
    %c0_52 = arith.constant 0 : index
    %c0_53 = arith.constant 0 : index
    %117 = vector.load %arg13[%c0_52, %c0_53] : memref<1x256xf32, #tpu.memory_space<vmem>>, vector<1x256xf32>
    %118 = vector.broadcast %117 : vector<1x256xf32> to vector<16x256xf32>
    %119 = arith.addf %116, %118 : vector<16x256xf32>
    %cst_54 = arith.constant dense<0xFF800000> : vector<16xf32>
    %120 = vector.multi_reduction <maximumf>, %119, %cst_54 [1] : vector<16x256xf32> to vector<16xf32>
    %121 = vector.shape_cast %120 : vector<16xf32> to vector<16x1xf32>
    %122 = vector.broadcast %121 : vector<16x1xf32> to vector<16x256xf32>
    %123 = arith.subf %119, %122 : vector<16x256xf32>
    %124 = math.exp %123 : vector<16x256xf32>
    %c0_55 = arith.constant 0 : index
    %c0_56 = arith.constant 0 : index
    %125 = vector.load %arg14[%c0_55, %c0_56] : memref<32x256xf32, #tpu.memory_space<vmem>>, vector<32x256xf32>
    %cst_57 = arith.constant dense<0.000000e+00> : vector<16x256xf32>
    %126 = tpu.matmul %1, %125, %cst_57 {dimension_numbers = #tpu.dot_dimension_numbers<[1], [0], [0], [1], [0, 0, 1, 1], [], []>} : vector<16x32xf32>, vector<32x256xf32>, vector<16x256xf32> -> vector<16x256xf32>
    %c0_58 = arith.constant 0 : index
    %c0_59 = arith.constant 0 : index
    %127 = vector.load %arg15[%c0_58, %c0_59] : memref<1x256xf32, #tpu.memory_space<vmem>>, vector<1x256xf32>
    %128 = vector.broadcast %127 : vector<1x256xf32> to vector<16x256xf32>
    %129 = arith.addf %126, %128 : vector<16x256xf32>
    %130 = arith.negf %129 : vector<16x256xf32>
    %131 = math.exp %130 : vector<16x256xf32>
    %cst_60 = arith.constant 1.000000e+00 : f32
    %132 = vector.broadcast %cst_60 : f32 to vector<16x256xf32>
    %133 = arith.addf %132, %131 : vector<16x256xf32>
    %134 = arith.divf %132, %133 : vector<16x256xf32>
    %c0_61 = arith.constant 0 : index
    %c0_62 = arith.constant 0 : index
    %135 = vector.load %arg16[%c0_61, %c0_62] : memref<1x256xf32, #tpu.memory_space<vmem>>, vector<1x256xf32>
    %136 = vector.broadcast %135 : vector<1x256xf32> to vector<16x256xf32>
    %137 = arith.mulf %136, %134 : vector<16x256xf32>
    %138 = arith.mulf %124, %137 : vector<16x256xf32>
    %139 = vector.shape_cast %138 : vector<16x256xf32> to vector<2x8x256xf32>
    %cst_63 = arith.constant dense<0.000000e+00> : vector<2x8xf32>
    %140 = vector.multi_reduction <add>, %139, %cst_63 [2] : vector<2x8x256xf32> to vector<2x8xf32>
    %141 = vector.shape_cast %124 : vector<16x256xf32> to vector<2x8x256xf32>
    %cst_64 = arith.constant dense<0.000000e+00> : vector<2x8xf32>
    %142 = vector.multi_reduction <add>, %141, %cst_64 [2] : vector<2x8x256xf32> to vector<2x8xf32>
    %143 = tpu.reciprocal %142 {approx = true} : vector<2x8xf32> -> vector<2x8xf32>
    %144 = arith.mulf %140, %143 : vector<2x8xf32>
    %c0_65 = arith.constant 0 : index
    %c0_66 = arith.constant 0 : index
    %c0_67 = arith.constant 0 : index
    %145 = vector.load %arg17[%c0_65, %c0_66, %c0_67] : memref<1x2x8xf32, #tpu.memory_space<vmem>>, vector<1x2x8xf32>
    %146 = vector.shape_cast %145 : vector<1x2x8xf32> to vector<2x8xf32>
    %147 = vector.shape_cast %144 : vector<2x8xf32> to vector<1x2x8xf32>
    tpu.vector_store %arg17[%c0_65, %c0_66, %c0_67], %147 {strides = array<i32>} : memref<1x2x8xf32, #tpu.memory_space<vmem>>, vector<1x2x8xf32>,
    return
  }
  func.func @transform_0(%arg0: i32) -> (i32, i32, i32) {
    %c0_i32 = arith.constant 0 : i32
    %c0_i32_0 = arith.constant 0 : i32
    %c0_i32_1 = arith.constant 0 : i32
    return %arg0, %c0_i32, %c0_i32_0 : i32, i32, i32
  }
  func.func @transform_1(%arg0: i32) -> (i32, i32, i32) {
    %c0_i32 = arith.constant 0 : i32
    %c0_i32_0 = arith.constant 0 : i32
    %c0_i32_1 = arith.constant 0 : i32
    return %arg0, %c0_i32, %c0_i32_0 : i32, i32, i32
  }
  func.func @transform_2(%arg0: i32) -> (i32, i32) {
    %c0_i32 = arith.constant 0 : i32
    %c0_i32_0 = arith.constant 0 : i32
    %c0_i32_1 = arith.constant 0 : i32
    return %c0_i32, %c0_i32_0 : i32, i32
  }
  func.func @transform_3(%arg0: i32) -> (i32, i32) {
    %c0_i32 = arith.constant 0 : i32
    %c0_i32_0 = arith.constant 0 : i32
    %c0_i32_1 = arith.constant 0 : i32
    return %c0_i32, %c0_i32_0 : i32, i32
  }
  func.func @transform_4(%arg0: i32) -> (i32, i32) {
    %c0_i32 = arith.constant 0 : i32
    %c0_i32_0 = arith.constant 0 : i32
    %c0_i32_1 = arith.constant 0 : i32
    return %c0_i32, %c0_i32_0 : i32, i32
  }
  func.func @transform_5(%arg0: i32) -> (i32, i32) {
    %c0_i32 = arith.constant 0 : i32
    %c0_i32_0 = arith.constant 0 : i32
    %c0_i32_1 = arith.constant 0 : i32
    return %c0_i32, %c0_i32_0 : i32, i32
  }
  func.func @transform_6(%arg0: i32) -> (i32, i32) {
    %c0_i32 = arith.constant 0 : i32
    %c0_i32_0 = arith.constant 0 : i32
    %c0_i32_1 = arith.constant 0 : i32
    return %c0_i32, %c0_i32_0 : i32, i32
  }
  func.func @transform_7(%arg0: i32) -> (i32, i32) {
    %c0_i32 = arith.constant 0 : i32
    %c0_i32_0 = arith.constant 0 : i32
    %c0_i32_1 = arith.constant 0 : i32
    return %c0_i32, %c0_i32_0 : i32, i32
  }
  func.func @transform_8(%arg0: i32) -> (i32, i32) {
    %c0_i32 = arith.constant 0 : i32
    %c0_i32_0 = arith.constant 0 : i32
    %c0_i32_1 = arith.constant 0 : i32
    return %c0_i32, %c0_i32_0 : i32, i32
  }
  func.func @transform_9(%arg0: i32) -> (i32, i32) {
    %c0_i32 = arith.constant 0 : i32
    %c0_i32_0 = arith.constant 0 : i32
    %c0_i32_1 = arith.constant 0 : i32
    return %c0_i32, %c0_i32_0 : i32, i32
  }
  func.func @transform_10(%arg0: i32) -> (i32, i32) {
    %c0_i32 = arith.constant 0 : i32
    %c0_i32_0 = arith.constant 0 : i32
    %c0_i32_1 = arith.constant 0 : i32
    return %c0_i32, %c0_i32_0 : i32, i32
  }
  func.func @transform_11(%arg0: i32) -> (i32, i32) {
    %c0_i32 = arith.constant 0 : i32
    %c0_i32_0 = arith.constant 0 : i32
    %c0_i32_1 = arith.constant 0 : i32
    return %c0_i32, %c0_i32_0 : i32, i32
  }
  func.func @transform_12(%arg0: i32) -> (i32, i32) {
    %c0_i32 = arith.constant 0 : i32
    %c0_i32_0 = arith.constant 0 : i32
    %c0_i32_1 = arith.constant 0 : i32
    return %c0_i32, %c0_i32_0 : i32, i32
  }
  func.func @transform_13(%arg0: i32) -> (i32, i32) {
    %c0_i32 = arith.constant 0 : i32
    %c0_i32_0 = arith.constant 0 : i32
    %c0_i32_1 = arith.constant 0 : i32
    return %c0_i32, %c0_i32_0 : i32, i32
  }
  func.func @transform_14(%arg0: i32) -> (i32, i32) {
    %c0_i32 = arith.constant 0 : i32
    %c0_i32_0 = arith.constant 0 : i32
    %c0_i32_1 = arith.constant 0 : i32
    return %c0_i32, %c0_i32_0 : i32, i32
  }
  func.func @transform_15(%arg0: i32) -> (i32, i32) {
    %c0_i32 = arith.constant 0 : i32
    %c0_i32_0 = arith.constant 0 : i32
    %c0_i32_1 = arith.constant 0 : i32
    return %c0_i32, %c0_i32_0 : i32, i32
  }
  func.func @transform_16(%arg0: i32) -> (i32, i32, i32) {
    %c0_i32 = arith.constant 0 : i32
    %c0_i32_0 = arith.constant 0 : i32
    %c0_i32_1 = arith.constant 0 : i32
    return %arg0, %c0_i32, %c0_i32_0 : i32, i32, i32
  }
}

</mosaic_0001>

<bundles_post_ra>
// kernel: improved_reward_head.1
= control target key start
LH: loop header
LB: loop body
LE: loop exit
PB: predicated region body
PF: predicated region fallthrough
CT: control target
= control target key end

     0   :  { %s3512_s0 = inlined_call_operand.hbm [shape: f32[2,8,32], index: 0, kind: input, shape index: {}]   ;;  %s3513_s1 = inlined_call_operand.hbm [shape: f32[2,8,32], index: 1, kind: input, shape index: {}]   ;;  %s3514_s2 = inlined_call_operand.hbm [shape: f32[32,32], index: 2, kind: input, shape index: {}]   ;;  %s3515_s3 = inlined_call_operand.vmem [shape: f32[1,32], index: 3, kind: input, shape index: {}]   ;;  %s3516_s4 = inlined_call_operand.hbm [shape: f32[32,384], index: 4, kind: input, shape index: {}]   ;;  %s3517_s5 = inlined_call_operand.vmem [shape: f32[1,384], index: 5, kind: input, shape index: {}]   ;;  %s3518_s6 = inlined_call_operand.hbm [shape: f32[32,64], index: 6, kind: input, shape index: {}]   ;;  %s3519_s7 = inlined_call_operand.hbm [shape: f32[64,64], index: 7, kind: input, shape index: {}]   ;;  %s3520_s8 = inlined_call_operand.vmem [shape: f32[1,64], index: 8, kind: input, shape index: {}]   ;;  %s3521_s9 = inlined_call_operand.hbm [shape: f32[64,256], index: 9, kind: input, shape index: {}]   ;;  %s3522_s10 = inlined_call_operand.vmem [shape: f32[1,256], index: 10, kind: input, shape index: {}]   ;;  %s3523_s11 = inlined_call_operand.hbm [shape: f32[256,256], index: 11, kind: input, shape index: {}]   ;;  %s3524_s12 = inlined_call_operand.hbm [shape: f32[1,256], index: 12, kind: input, shape index: {}]   ;;  %s3525_s13 = inlined_call_operand.hbm [shape: f32[32,256], index: 13, kind: input, shape index: {}]   ;;  %s3526_s14 = inlined_call_operand.vmem [shape: f32[1,256], index: 14, kind: input, shape index: {}]   ;;  %s3527_s15 = inlined_call_operand.vmem [shape: f32[1,256], index: 15, kind: input, shape index: {}]   ;;  %s3528_s16 = inlined_call_operand.hbm [shape: f32[1,2,8], index: 16, kind: output, shape index: {}]  }
   0x1   :  { %3529 = sst [smem:[#allocation27_spill]] %s3512_s0 }
   0x2   :  { %21 = vsyncpa [#allocation3], 0 }
   0x3   :  { %22 = vsyncpa [#allocation6], 0 }
   0x4   :  { %23 = vsyncpa [#allocation9], 0 }
   0x5   :  { %24 = vsyncpa [#allocation12], 0 }
   0x6   :  { %25 = vsyncpa [#allocation15], 0 }
   0x7   :  { %26 = vsyncpa [#allocation18], 0 }
   0x8   :  { %27 = vsyncpa [#allocation4], 0  ;;  %s3113_s21 = smov [#allocation5]   ;;  %s3114_s23 = smov [#allocation8]  }
   0x9   :  { %s45_s22 = sshll.u32 %s3113_s21, 4  ;;  %s71_s24 = sshll.u32 %s3114_s23, 4  ;;  %s46_s22 = int_to_ptr.vmem [resolvable:$true] %s45_s22  ;;  %s72_s24 = int_to_ptr.vmem [resolvable:$true] %s71_s24 }
   0xa   :  { %s2887_s25 = scalar_lea.vmem %s46_s22, 256  ;;  %p2892_p1 = scmp.lt.s32.totalorder %s46_s22, %s46_s22 }
   0xb   :  { %p2888_p0 = scmp.ne.s32.totalorder %s46_s22, %s2887_s25  ;;  %p2893_p2 = scmp.lt.s32.totalorder %s2887_s25, %s2887_s25 }
   0xd   :  { %p2894_p3 = por %p2893_p2, %p2892_p1 }
   0xf   :  { %p2895_p4 = pnand %p2894_p3, %p2888_p0 }
  0x11   :  { %2898 = shalt.err (!%p2895_p4)
}
  0x12   :  { %s3115_s26 = smov 128   ;;  %s3116_s27 = smov 8  }
  0x13   :  { %51 = dma.hbm_to_vmem [thread:$0]  %s3513_s1, 256, %s46_s22, [#allocation6], %s3115_s26, %s3115_s26, %s3116_s27  }
  0x14   :  { %s2907_s30 = scalar_lea.vmem %s72_s24, 1536  ;;  %p2912_p6 = scmp.lt.s32.totalorder %s72_s24, %s72_s24 }
  0x15   :  { %p2908_p5 = scmp.ne.s32.totalorder %s72_s24, %s2907_s30  ;;  %p2913_p7 = scmp.lt.s32.totalorder %s2907_s30, %s2907_s30 }
  0x17   :  { %p2914_p8 = por %p2913_p7, %p2912_p6 }
  0x19   :  { %p2915_p9 = pnand %p2914_p8, %p2908_p5 }
  0x1b   :  { %2918 = shalt.err (!%p2915_p9)
}
  0x1c   :  { %s3117_s0 = smov 384   ;;  %s3118_s17 = smov 24  }
  0x1d   :  { %77 = dma.hbm_to_vmem [thread:$0]  %s3516_s4, 1536, %s72_s24, [#allocation9], %s3117_s0, %s3117_s0, %s3118_s17  }
  0x1e   :  { %s3119_s20 = smov [#allocation11]  }
  0x1f   :  { %s97_s21 = sshll.u32 %s3119_s20, 4  ;;  %s98_s21 = int_to_ptr.vmem [resolvable:$true] %s97_s21 }
  0x20   :  { %s2927_s23 = scalar_lea.vmem %s98_s21, 1024  ;;  %p2932_p11 = scmp.lt.s32.totalorder %s98_s21, %s98_s21 }
  0x21   :  { %p2928_p10 = scmp.ne.s32.totalorder %s98_s21, %s2927_s23  ;;  %p2933_p12 = scmp.lt.s32.totalorder %s2927_s23, %s2927_s23 }
  0x23   :  { %p2934_p13 = por %p2933_p12, %p2932_p11 }
  0x25   :  { %p2935_p0 = pnand %p2934_p13, %p2928_p10 }
  0x27   :  { %2938 = shalt.err (!%p2935_p0)
}
  0x28   :  { %103 = dma.hbm_to_vmem [thread:$0]  %s3519_s7, 1024, %s98_s21, [#allocation12], %s3115_s26, %s3115_s26, %s3116_s27  }
  0x29   :  { %s3120_s25 = smov [#allocation14]   ;;  %s3121_s4 = smov [#allocation2]  }
  0x2a   :  { %s125_s28 = sshll.u32 %s3120_s25, 4  ;;  %s33_s24 = sshll.u32 %s3121_s4, 4  ;;  %s126_s28 = int_to_ptr.vmem [resolvable:$true] %s125_s28  ;;  %s34_s24 = int_to_ptr.vmem [resolvable:$true] %s33_s24 }
  0x2b   :  { %s2947_s29 = scalar_lea.vmem %s126_s28, 8192  ;;  %p2952_p2 = scmp.lt.s32.totalorder %s126_s28, %s126_s28 }
  0x2c   :  { %p2948_p1 = scmp.ne.s32.totalorder %s126_s28, %s2947_s29  ;;  %p2953_p3 = scmp.lt.s32.totalorder %s2947_s29, %s2947_s29 }
  0x2e   :  { %p2954_p4 = por %p2953_p3, %p2952_p2 }
  0x30   :  { %p2955_p5 = pnand %p2954_p4, %p2948_p1 }
  0x32   :  { %2958 = shalt.err (!%p2955_p5)
}
  0x33   :  { %s3122_s30 = smov 256   ;;  %s3123_s0 = smov 16  }
  0x34   :  { %131 = dma.hbm_to_vmem [thread:$0]  %s3523_s11, 8192, %s126_s28, [#allocation15], %s3122_s30, %s3122_s30, %s3123_s0  }
  0x35   :  { %s2967_s7 = scalar_lea.vmem %s34_s24, 256  ;;  %p2972_p7 = scmp.lt.s32.totalorder %s34_s24, %s34_s24 }
  0x36   :  { %p2968_p6 = scmp.ne.s32.totalorder %s34_s24, %s2967_s7  ;;  %p2973_p8 = scmp.lt.s32.totalorder %s2967_s7, %s2967_s7 }
  0x38   :  { %p2974_p9 = por %p2973_p8, %p2972_p7 }
  0x3a   :  { %p2975_p10 = pnand %p2974_p9, %p2968_p6 }
  0x3c   :  { %2978 = shalt.err (!%p2975_p10)
}
  0x3d   :  { %s3530_s21 = sld [smem:[#allocation27_spill]]  ;;  %s3124_s23 = smov [#allocation7]  }
  0x3e   :  { %s57_s1 = sshll.u32 %s3124_s23, 4  ;;  %s3125_s22 = smov [#allocation10]   ;;  %s58_s1 = int_to_ptr.vmem [resolvable:$true] %s57_s1 }
  0x3f   :  { %s85_s11 = sshll.u32 %s3125_s22, 4  ;;  %s2987_s25 = scalar_lea.vmem %s58_s1, 512  ;;  %s86_s11 = int_to_ptr.vmem [resolvable:$true] %s85_s11 }
  0x40   :  { %p2988_p11 = scmp.ne.s32.totalorder %s58_s1, %s2987_s25  ;;  %p2992_p12 = scmp.lt.s32.totalorder %s58_s1, %s58_s1 }
  0x41   :  { %p2993_p13 = scmp.lt.s32.totalorder %s2987_s25, %s2987_s25 }
  0x43   :  { %39 = dma.hbm_to_vmem [thread:$0]  %s3530_s21, 256, %s34_s24, [#allocation3], %s3115_s26, %s3115_s26, %s3116_s27  }
  0x44   :  { %p2994_p0 = por %p2993_p13, %p2992_p12 }
  0x46   :  { %p2995_p1 = pnand %p2994_p0, %p2988_p11 }
  0x48   :  { %2998 = shalt.err (!%p2995_p1)
}
  0x49   :  { %63 = dma.hbm_to_vmem [thread:$0]  %s3514_s2, 512, %s58_s1, [#allocation6], %s3115_s26, %s3115_s26, %s3116_s27  }
  0x4a   :  { %s3007_s24 = scalar_lea.vmem %s86_s11, 512  ;;  %p3012_p3 = scmp.lt.s32.totalorder %s86_s11, %s86_s11 }
  0x4b   :  { %p3008_p2 = scmp.ne.s32.totalorder %s86_s11, %s3007_s24  ;;  %p3013_p4 = scmp.lt.s32.totalorder %s3007_s24, %s3007_s24 }
  0x4d   :  { %p3014_p5 = por %p3013_p4, %p3012_p3 }
  0x4f   :  { %p3015_p6 = pnand %p3014_p5, %p3008_p2 }
  0x51   :  { %3018 = shalt.err (!%p3015_p6)
}
  0x52   :  { %91 = dma.hbm_to_vmem [thread:$0]  %s3518_s6, 512, %s86_s11, [#allocation9], %s3115_s26, %s3115_s26, %s3116_s27  }
  0x53   :  { %s3126_s18 = smov [#allocation13]   ;;  %s3127_s19 = smov [#allocation16]  }
  0x54   :  { %s111_s7 = sshll.u32 %s3126_s18, 4  ;;  %s138_s2 = sshll.u32 %s3127_s19, 4  ;;  %s112_s7 = int_to_ptr.vmem [resolvable:$true] %s111_s7  ;;  %s139_s2 = int_to_ptr.vmem [resolvable:$true] %s138_s2 }
  0x55   :  { %s3027_s20 = scalar_lea.vmem %s112_s7, 2048  ;;  %p3032_p8 = scmp.lt.s32.totalorder %s112_s7, %s112_s7 }
  0x56   :  { %p3028_p7 = scmp.ne.s32.totalorder %s112_s7, %s3027_s20  ;;  %p3033_p9 = scmp.lt.s32.totalorder %s3027_s20, %s3027_s20 }
  0x58   :  { %p3034_p10 = por %p3033_p9, %p3032_p8 }
  0x5a   :  { %p3035_p11 = pnand %p3034_p10, %p3028_p7 }
  0x5c   :  { %3038 = shalt.err (!%p3035_p11)
}
  0x5d   :  { %117 = dma.hbm_to_vmem [thread:$0]  %s3521_s9, 2048, %s112_s7, [#allocation12], %s3122_s30, %s3122_s30, %s3123_s0  }
  0x5e   :  { %s3047_s6 = scalar_lea.vmem %s139_s2, 32  ;;  %p3052_p13 = scmp.lt.s32.totalorder %s139_s2, %s139_s2 }
  0x5f   :  { %p3048_p12 = scmp.ne.s32.totalorder %s139_s2, %s3047_s6  ;;  %p3053_p0 = scmp.lt.s32.totalorder %s3047_s6, %s3047_s6 }
  0x61   :  { %p3054_p1 = por %p3053_p0, %p3052_p13 }
  0x63   :  { %p3055_p2 = pnand %p3054_p1, %p3048_p12 }
  0x65   :  { %3058 = shalt.err (!%p3055_p2)
}
  0x66   :  { %141 = dma.hbm_to_vmem [thread:$0]  %s3524_s12, 32, %s139_s2, [#allocation15]  }
  0x67   :  { %s3128_s1 = smov [#allocation17]  }
  0x68   :  { %s147_s22 = sshll.u32 %s3128_s1, 4  ;;  %s148_s22 = int_to_ptr.vmem [resolvable:$true] %s147_s22 }
  0x69   :  { %s3067_s11 = scalar_lea.vmem %s148_s22, 1024  ;;  %p3072_p4 = scmp.lt.s32.totalorder %s148_s22, %s148_s22 }
  0x6a   :  { %p3068_p3 = scmp.ne.s32.totalorder %s148_s22, %s3067_s11  ;;  %p3073_p5 = scmp.lt.s32.totalorder %s3067_s11, %s3067_s11 }
  0x6c   :  { %p3074_p6 = por %p3073_p5, %p3072_p4 }
  0x6e   :  { %p3075_p7 = pnand %p3074_p6, %p3068_p3 }
  0x70   :  { %3078 = shalt.err (!%p3075_p7)
}
  0x71   :  { %153 = dma.hbm_to_vmem [thread:$0]  %s3525_s13, 1024, %s148_s22, [#allocation18], %s3122_s30, %s3122_s30, %s3123_s0  }
  0x72   :  { %3099 = dma.done.wait [#allocation3], 256  }
  0x73   :  { %3100 = vsyncadd [#allocation3], 4294967040 }
  0x74   :  { %3101 = dma.done.wait [#allocation6], 768  }
  0x75   :  { %3102 = vsyncadd [#allocation6], 4294966528 }
  0x76   :  { %3103 = dma.done.wait [#allocation9], 2048  }
  0x77   :  { %3104 = vsyncadd [#allocation9], 4294965248 }
  0x78   :  { %3105 = dma.done.wait [#allocation12], 3072  }
  0x79   :  { %3106 = vsyncadd [#allocation12], 4294964224 }
  0x7a   :  { %3107 = dma.done.wait [#allocation15], 8224  }
  0x7b   :  { %3108 = vsyncadd [#allocation15], 4294959072 }
  0x7c   :  { %3109 = dma.done.wait [#allocation18], 1024  }
  0x7d   :  { %3110 = vsyncadd [#allocation18], 4294966272  ;;  %vm203_vm0 = vcmask 261120   ;;  %v195_v0 = vld [vmem:[#allocation7 + $0x18] sm:$0xff]  ;;  %v194_v1 = vld [vmem:[#allocation7 + $0x10] sm:$0xff]  ;;  %v3129_v15 = vmov 0.0   ;;  %v313_v40 = vlaneseq }
  0x7e   :  { %2637 = vmatprep.subr.mxu1 %v195_v0  ;;  %v188_v2 = vld [vmem:[#allocation2] sm:$0xff]  ;;  %v193_v3 = vld [vmem:[#allocation7 + $0x8] sm:$0xff]  ;;  %v309_v6 = vld [vmem:[#allocation8 + $0x50] sm:$0xff]  ;;  %vm573_vm1 = vcmask 130048   ;;  %s3130_s28 = smov 112   ;;  %vm3131_vm2 = vmmov 0  }
  0x7f   :  { %2638 = vmatpush3.msra.mxu1 %v195_v0  ;;  %2645 = vmatprep.mubr.msk.f32.mxu1 %vm203_vm0, %v188_v2  ;;  %v192_v4 = vld [vmem:[#allocation7] sm:$0xff]  ;;  %v189_v5 = vld [vmem:[#allocation2 + $0x8] sm:$0xff]  ;;  %v306_v8 = vld [vmem:[#allocation8 + $0x38] sm:$0xff]  ;;  %v3292_v41 = vshrl.u32 %v313_v40, 7  ;;  %vm728_vm3 = vcmask 64512   ;;  %s3133_s4 = smov 80  }
  0x80   :  { %2639 = vmatprep.subr.mxu1 %v194_v1  ;;  %v308_v7 = vld [vmem:[#allocation8 + $0x48] sm:$0xff]  ;;  %v305_v9 = vld [vmem:[#allocation8 + $0x30] sm:$0xff]  ;;  %v303_v10 = vld [vmem:[#allocation8 + $0x20] sm:$0xff]  ;;  %s3134_s24 = smov 32   ;;  %vm1923_vm4 = vcmask 392192   ;;  %vm1941_vm5 = vcmask 523264  }
  0x81   :  { %2640 = vmatpush3.msra.mxu1 %v194_v1  ;;  %v302_v11 = vld [vmem:[#allocation8 + $0x18] sm:$0xff]  ;;  %v300_v12 = vld [vmem:[#allocation8 + $0x8] sm:$0xff]  ;;  %v299_v14 = vld [vmem:[#allocation8] sm:$0xff]  ;;  %v3295_v42 = vsub.s32 0, %v3292_v41  ;;  %v3301_v44 = vsub.s32 1, %v3292_v41  ;;  %v323_v53 = vsub.s32 2, %v3292_v41 }
  0x82   :  { %2641 = vmatprep.subr.mxu1 %v193_v3  ;;  %v310_v13 = vld [vmem:[#allocation8 + $0x58] sm:$0xff]  ;;  %v190_v16 = vld [vmem:[#allocation5] sm:$0xff]  ;;  %v307_v17 = vld [vmem:[#allocation8 + $0x40] sm:$0xff]  ;;  %vm2502_vm6 = vcmask 1041409   ;;  %vm2505_vm7 = vcmask 58368  }
  0x83   :  { %2642 = vmatpush3.msra.mxu1 %v193_v3  ;;  %2648 = vmatprep.subr.mxu0 %v310_v13  ;;  %v489_v18 = vld [vmem:[#allocation10 + $0x18] sm:$0xff]  ;;  %v304_v19 = vld [vmem:[#allocation8 + $0x28] sm:$0xff]  ;;  %v488_v20 = vld [vmem:[#allocation10 + $0x10] sm:$0xff] }
  0x84   :  { %2643 = vmatprep.subr.mxu1 %v192_v4  ;;  %2649 = vmatpush3.msra.mxu0 %v310_v13  ;;  %v191_v21 = vld [vmem:[#allocation5 + $0x8] sm:$0xff]  ;;  %v301_v22 = vld [vmem:[#allocation8 + $0x10] sm:$0xff]  ;;  %v487_v23 = vld [vmem:[#allocation10 + $0x8] sm:$0xff] }
  0x85   :  { %2644 = vmatpush3.msra.mxu1 %v192_v4  ;;  %2650 = vmatprep.subr.mxu0 %v307_v17  ;;  %v486_v24 = vld [vmem:[#allocation10] sm:$0xff] }
  0x86   :  { %2646 = vmatmul.mubr.msk.f32.vlgmr.msra.gmra.mxu1 %vm203_vm0, %v189_v5  ;;  %358 = vmatprep.subr.mxu1 %v309_v6  ;;  %v2527_v25 = vld [vmem:[%s3515_s3] ss:$0 sm:$0xff] }
  0x87   :  { %359 = vmatpush1.msra.mxu1 %v308_v7  ;;  %398 = vmatprep.mubr.f32.mxu1 %v3129_v15  ;;  %v311_v43 = vld [vmem:[%s3517_s5] sm:$0x7]  ;;  %s3132_s5 = smov 96  }
  0x88   :  { %360 = vmatprep.subr.mxu1 %v306_v8  ;;  %2651 = vmatpush3.msra.mxu0 %v307_v17  ;;  %v316_v45 = vrot.slane %v311_v43, %v3295_v42  ;;  %v320_v46 = vrot.slane %v311_v43, %v3301_v44  ;;  %v324_v54 = vrot.slane %v311_v43, %v323_v53 }
  0x89   :  { %361 = vmatpush1.msra.mxu1 %v305_v9  ;;  %2652 = vmatprep.subr.mxu0 %v304_v19 }
  0x8a   :  { %362 = vmatprep.subr.mxu1 %v303_v10  ;;  %2653 = vmatpush3.msra.mxu0 %v304_v19 }
  0x8b   :  { %363 = vmatpush1.msra.mxu1 %v302_v11  ;;  %2654 = vmatprep.subr.mxu0 %v301_v22 }
  0x8c   :  { %364 = vmatprep.subr.mxu1 %v300_v12  ;;  %2655 = vmatpush3.msra.mxu0 %v301_v22 }
  0x8d   :  { %365 = vmatpush1.msra.mxu1 %v299_v14  ;;  %2656 = vmatprep.mubr.msk.f32.mxu0 %vm203_vm0, %v190_v16 }
  0x8e   :  { %2532 = vmatmul.mubr.msk.f32.vlgmr.msra.gmra.mxu1 %vm203_vm0, %v190_v16  ;;  %2659 = vmatprep.subr.mxu1 %v489_v18 }
  0x8f   :  { %404 = vmatprep.mubr.f32.mxu1 %v3129_v15  ;;  %2660 = vmatpush3.msra.mxu1 %v489_v18 }
  0x90   :  { %2661 = vmatprep.subr.mxu1 %v488_v20  ;;  %2657 = vmatmul.mubr.msk.f32.vlgmr.msra.gmra.mxu0 %vm203_vm0, %v191_v21 }
  0x91   :  { %2662 = vmatpush3.msra.mxu1 %v488_v20  ;;  %2680 = vmatprep.subr.mxu0 %v3129_v15 }
  0x92   :  { %2533 = vmatmul.mubr.msk.f32.gmra.mxu1 %vm203_vm0, %v191_v21  ;;  %2663 = vmatprep.subr.mxu1 %v487_v23 }
  0x93   :  { %2664 = vmatpush3.msra.mxu1 %v487_v23  ;;  %2682 = vmatprep.mubr.msk.f32.mxu0 %vm3131_vm2, %v3129_v15 }
  0x94   :  { %2665 = vmatprep.subr.mxu1 %v486_v24 }
  0x95   :  { %2666 = vmatpush3.msra.mxu1 %v486_v24 }
  0x96   :  { %2670 = vmatprep.subr.mxu1 %v3129_v15 }
 0x146   :  { %v2647_v26 = vpop.f32.mrf.mxu1 }
 0x147   :  { %v282_v27 = vadd.f32 %v2647_v26, %v2527_v25 }
 0x148   :  { %v276_v28 = vpop.f32.mrf.mxu1 }
 0x149   :  { %v2531_v29 = vmul.f32 -1.442695, %v282_v27  ;;  %v277_v30 = vadd.f32 %v2527_v25, %v276_v28 }
 0x14b   :  { %2793 = vpow2.f32 %v2531_v29  ;;  %v2530_v31 = vmul.f32 -1.442695, %v277_v30 }
 0x14d   :  { %2795 = vpow2.f32 %v2530_v31 }
 0x14e   :  { %v400_v47 = vpop.f32.mrf.mxu1 }
 0x14f   :  { %v3305_v48 = vadd.f32 %v400_v47, %v316_v45 }
 0x150   :  { %v402_v49 = vpop.f32.mrf.mxu1  ;;  %v2658_v55 = vpop.f32.mrf.mxu0 }
 0x151   :  { %v3307_v50 = vadd.f32 %v402_v49, %v320_v46  ;;  %899 = vrot.lane.b32.xlu1 %v3305_v48, %s3130_s28  ;;  %v483_v56 = vadd.f32 %v2658_v55, %v324_v54 }
 0x152   :  { %v406_v51 = vpop.f32.mrf.mxu1  ;;  %v477_v58 = vpop.f32.mrf.mxu0 }
 0x153   :  { %2681 = vmatpush3.msra.mxu0 %v3307_v50  ;;  %v3315_v52 = vadd.f32 %v406_v51, %v316_v45  ;;  %v478_v60 = vadd.f32 %v477_v58, %v324_v54 }
 0x154   :  { %2690 = vmatprep.subr.mxu0 %v3129_v15  ;;  %v408_v57 = vpop.f32.mrf.mxu1 }
 0x155   :  { %977 = vrot.lane.b32.xlu1 %v3315_v52, %s3130_s28  ;;  %v3340_v0 = vadd.f32 %v408_v57, %v320_v46 }
 0x158   :  { %v2794_v32 = vpop.eup %2793 }
 0x159   :  { %v292_v33 = vadd.f32 1.0, %v2794_v32 }
 0x15a   :  { %v2796_v34 = vpop.eup %2795 }
 0x15b   :  { %v291_v35 = vadd.f32 1.0, %v2796_v34  ;;  %2797 = vrcp.f32 %v292_v33 }
 0x15d   :  { %2799 = vrcp.f32 %v291_v35 }
 0x168   :  { %v2798_v36 = vpop.eup %2797 }
 0x169   :  { %v298_v39 = vmul.f32 %v2798_v36, %v282_v27 }
 0x16a   :  { %v2800_v37 = vpop.eup %2799 }
 0x16b   :  { %v297_v38 = vmul.f32 %v2800_v37, %v277_v30 }
 0x16d   :  { %2667 = vmatprep.mubr.msk.f32.mxu1 %vm203_vm0, %v297_v38 }
 0x16e   :  { %2668 = vmatmul.mubr.msk.f32.vlgmr.msra.gmra.mxu1 %vm203_vm0, %v298_v39 }
 0x16f   :  { %2671 = vmatpush3.xpose.msk.msra.mxu1 %vm573_vm1, %v3305_v48  ;;  %2672 = vmatprep.mubr.msk.f32.mxu1 %vm3131_vm2, %v3129_v15 }
 0x170   :  { %2675 = vmatprep.subr.mxu1 %v3129_v15 }
 0x1c3   :  { %v900_v13 = vpop.permute.xlu1 %899 }
 0x1c7   :  { %v978_v17 = vpop.permute.xlu1 %977 }
 0x22e   :  { %v2669_v59 = vpop.f32.mrf.mxu1 }
 0x22f   :  { %v3325_v61 = vadd.f32 %v2669_v59, %v483_v56 }
 0x230   :  { %v562_v62 = vpop.f32.mrf.mxu1 }
 0x231   :  { %v3327_v63 = vadd.f32 %v562_v62, %v478_v60  ;;  %975 = vrot.lane.b32.xlu1 %v3325_v61, %s3130_s28 }
 0x233   :  { %2673 = vmatmul.mubr.msk.f32.vlgmr.msra.gmra.mxu1 %vm573_vm1, %v3327_v63 }
 0x234   :  { %2676 = vmatpush3.xpose.msk.msra.mxu1 %vm573_vm1, %v3315_v52  ;;  %2677 = vmatprep.mubr.msk.f32.mxu1 %vm3131_vm2, %v3129_v15 }
 0x235   :  { %1074 = vrot.lane.b32.xlu1 %v3307_v50, %s3130_s28  ;;  %2685 = vmatprep.subr.mxu1 %v3129_v15 }
 0x237   :  { %2678 = vmatmul.mubr.msk.f32.vlgmr.msra.gmra.mxu1 %vm573_vm1, %v3325_v61 }
 0x238   :  { %2686 = vmatpush3.msra.mxu1 %v3340_v0  ;;  %2687 = vmatprep.mubr.msk.f32.mxu1 %vm3131_vm2, %v3129_v15 }
 0x239   :  { %2695 = vmatprep.subr.mxu1 %v3129_v15 }
 0x2a3   :  { %v976_v18 = vpop.permute.xlu1 %975 }
 0x2a7   :  { %v1075_v22 = vpop.permute.xlu1 %1074 }
 0x2f3   :  { %v646_v1 = vpop.f32.mrf.mxu1 }
 0x2f4   :  { %v726_v2 = vmul.f32 0.25, %v646_v1 }
 0x2f5   :  { %v2674_v3 = vpop.f32.mrf.mxu1 }
 0x2f6   :  { %v729_v4 = vsel %vm728_vm3, %v726_v2, -inf }
 0x2f7   :  { %730 = vmax.xlane.f32.xlu0 %v729_v4  ;;  %v722_v5 = vpop.f32.mrf.mxu1 }
 0x2f8   :  { %v727_v6 = vmul.f32 0.25, %v722_v5 }
 0x2f9   :  { %v2679_v7 = vpop.f32.mrf.mxu1 }
 0x2fa   :  { %v732_v8 = vsel %vm728_vm3, %v727_v6, -inf }
 0x2fb   :  { %733 = vmax.xlane.f32.xlu0 %v732_v8 }
 0x311   :  { %897 = vrot.lane.b32.xlu0 %v3327_v63, %s3130_s28 }
 0x380   :  { %v731_v9 = vpop.xlane.xlu0 %730 }
 0x381   :  { %v735_v10 = vsub.f32 %v726_v2, %v731_v9 }
 0x383   :  { %v737_v11 = vmul.f32 1.442695, %v735_v10 }
 0x384   :  { %v734_v12 = vpop.xlane.xlu0 %733 }
 0x385   :  { %2801 = vpow2.f32 %v737_v11  ;;  %v736_v14 = vsub.f32 %v727_v6, %v734_v12 }
 0x387   :  { %v739_v16 = vmul.f32 1.442695, %v736_v14 }
 0x388   :  { %v898_v21 = vpop.permute.xlu0 %897 }
 0x389   :  { %2803 = vpow2.f32 %v739_v16 }
 0x392   :  { %v3352_v19 = vpop.eup %2801 }
 0x393   :  { %2683 = vmatmul.mubr.msk.f32.vlgmr.msra.gmra.mxu0 %vm728_vm3, %v3352_v19 }
 0x394   :  { %2691 = vmatpush3.xpose.msk.msra.mxu0 %vm573_vm1, %v900_v13  ;;  %2692 = vmatprep.mubr.msk.f32.mxu0 %vm3131_vm2, %v3129_v15 }
 0x395   :  { %2700 = vmatprep.subr.mxu0 %v3129_v15 }
 0x396   :  { %v3360_v20 = vpop.eup %2803 }
 0x397   :  { %2688 = vmatmul.mubr.msk.f32.vlgmr.msra.gmra.mxu1 %vm728_vm3, %v3360_v20  ;;  %2693 = vmatmul.mubr.msk.f32.vlgmr.msra.gmra.mxu0 %vm573_vm1, %v898_v21 }
 0x398   :  { %2696 = vmatpush3.xpose.msk.msra.mxu1 %vm573_vm1, %v978_v17  ;;  %2701 = vmatpush3.msra.mxu0 %v1075_v22 }
 0x399   :  { %2697 = vmatprep.mubr.msk.f32.mxu1 %vm3131_vm2, %v3129_v15  ;;  %2705 = vmatprep.subr.mxu1 %v3129_v15 }
 0x39a   :  { %2702 = vmatprep.mubr.msk.f32.mxu0 %vm3131_vm2, %v3129_v15  ;;  %2710 = vmatprep.subr.mxu0 %v3129_v15 }
 0x39b   :  { %2698 = vmatmul.mubr.msk.f32.vlgmr.msra.gmra.mxu1 %vm573_vm1, %v976_v18 }
 0x39c   :  { %2707 = vmatprep.mubr.msk.f32.mxu1 %vm3131_vm2, %v3129_v15 }
 0x453   :  { %v3375_v23 = vpop.f32.mrf.mxu0 }
 0x455   :  { %v2684_v24 = vpop.f32.mrf.mxu0 }
 0x457   :  { %v3377_v25 = vpop.f32.mrf.mxu1  ;;  %v971_v26 = vpop.f32.mrf.mxu0 }
 0x458   :  { %v1053_v27 = vmul.f32 0.25, %v971_v26 }
 0x459   :  { %v2689_v28 = vpop.f32.mrf.mxu1  ;;  %v2694_v29 = vpop.f32.mrf.mxu0 }
 0x45a   :  { %v1055_v30 = vsel %vm728_vm3, %v1053_v27, -inf }
 0x45b   :  { %1056 = vmax.xlane.f32.xlu1 %v1055_v30  ;;  %v1049_v31 = vpop.f32.mrf.mxu1 }
 0x45c   :  { %v1054_v32 = vmul.f32 0.25, %v1049_v31 }
 0x45d   :  { %v2699_v33 = vpop.f32.mrf.mxu1 }
 0x45e   :  { %v1058_v34 = vsel %vm728_vm3, %v1054_v32, -inf }
 0x45f   :  { %1059 = vmax.xlane.f32.xlu0 %v1058_v34 }
 0x46c   :  { %1233 = vrot.lane.b32.xlu1 %v3305_v48, %s3132_s5 }
 0x470   :  { %1311 = vrot.lane.b32.xlu1 %v3315_v52, %s3132_s5 }
 0x474   :  { %1231 = vrot.lane.b32.xlu1 %v3327_v63, %s3132_s5 }
 0x475   :  { %1151 = vrot.lane.b32.xlu0 %v3340_v0, %s3130_s28 }
 0x478   :  { %1309 = vrot.lane.b32.xlu1 %v3325_v61, %s3132_s5 }
 0x479   :  { %1407 = vrot.lane.b32.xlu0 %v3307_v50, %s3132_s5 }
 0x47c   :  { %1483 = vrot.lane.b32.xlu1 %v3340_v0, %s3132_s5 }
 0x480   :  { %1565 = vrot.lane.b32.xlu1 %v3305_v48, %s3133_s4 }
 0x4e4   :  { %v1057_v35 = vpop.xlane.xlu1 %1056 }
 0x4e5   :  { %v1061_v36 = vsub.f32 %v1053_v27, %v1057_v35 }
 0x4e7   :  { %v1063_v37 = vmul.f32 1.442695, %v1061_v36 }
 0x4e8   :  { %v1234_v38 = vpop.permute.xlu1 %1233  ;;  %v1060_v39 = vpop.xlane.xlu0 %1059 }
 0x4e9   :  { %2805 = vpow2.f32 %v1063_v37  ;;  %v1062_v43 = vsub.f32 %v1054_v32, %v1060_v39 }
 0x4eb   :  { %v1065_v45 = vmul.f32 1.442695, %v1062_v43 }
 0x4ec   :  { %v1152_v46 = vpop.permute.xlu0 %1151  ;;  %v1312_v47 = vpop.permute.xlu1 %1311 }
 0x4ed   :  { %2807 = vpow2.f32 %v1065_v45  ;;  %2706 = vmatpush3.msra.mxu1 %v1152_v46 }
 0x4ee   :  { %2715 = vmatprep.subr.mxu1 %v3129_v15 }
 0x4f0   :  { %v1232_v49 = vpop.permute.xlu1 %1231  ;;  %v1408_v54 = vpop.permute.xlu0 %1407 }
 0x4f4   :  { %v1310_v48 = vpop.permute.xlu1 %1309 }
 0x4f6   :  { %v3392_v51 = vpop.eup %2805 }
 0x4f7   :  { %2703 = vmatmul.mubr.msk.f32.vlgmr.msra.gmra.mxu0 %vm728_vm3, %v3392_v51  ;;  %v1067_v33 = vsel %vm728_vm3, %v3392_v51, 0.0 }
 0x4f8   :  { %2711 = vmatpush3.xpose.msk.msra.mxu0 %vm573_vm1, %v1234_v38  ;;  %2712 = vmatprep.mubr.msk.f32.mxu0 %vm3131_vm2, %v3129_v15  ;;  %v1484_v55 = vpop.permute.xlu1 %1483 }
 0x4f9   :  { %2720 = vmatprep.subr.mxu0 %v3129_v15 }
 0x4fa   :  { %v3400_v53 = vpop.eup %2807 }
 0x4fb   :  { %2708 = vmatmul.mubr.msk.f32.vlgmr.msra.gmra.mxu1 %vm728_vm3, %v3400_v53  ;;  %2713 = vmatmul.mubr.msk.f32.vlgmr.msra.gmra.mxu0 %vm573_vm1, %v1232_v49  ;;  %v1070_v35 = vsel %vm728_vm3, %v3400_v53, 0.0 }
 0x4fc   :  { %2716 = vmatpush3.xpose.msk.msra.mxu1 %vm573_vm1, %v1312_v47  ;;  %2721 = vmatpush3.msra.mxu0 %v1408_v54  ;;  %v1566_v7 = vpop.permute.xlu1 %1565  ;;  %v744_v54 = vsel %vm728_vm3, %v3360_v20, 0.0 }
 0x4fd   :  { %2717 = vmatprep.mubr.msk.f32.mxu1 %vm3131_vm2, %v3129_v15  ;;  %2725 = vmatprep.subr.mxu1 %v3129_v15 }
 0x4fe   :  { %2722 = vmatprep.mubr.msk.f32.mxu0 %vm3131_vm2, %v3129_v15  ;;  %2730 = vmatprep.subr.mxu0 %v3129_v15 }
 0x4ff   :  { %2718 = vmatmul.mubr.msk.f32.vlgmr.msra.gmra.mxu1 %vm573_vm1, %v1310_v48  ;;  %v741_v48 = vsel %vm728_vm3, %v3352_v19, 0.0 }
 0x500   :  { %2726 = vmatpush3.msra.mxu1 %v1484_v55  ;;  %2727 = vmatprep.mubr.msk.f32.mxu1 %vm3131_vm2, %v3129_v15 }
 0x501   :  { %2735 = vmatprep.subr.mxu1 %v3129_v15 }
 0x5b7   :  { %v3416_v56 = vpop.f32.mrf.mxu0 }
 0x5b9   :  { %v2704_v57 = vpop.f32.mrf.mxu0 }
 0x5bb   :  { %v3418_v58 = vpop.f32.mrf.mxu1  ;;  %v1305_v59 = vpop.f32.mrf.mxu0 }
 0x5bc   :  { %v1387_v60 = vmul.f32 0.25, %v1305_v59 }
 0x5bd   :  { %v2709_v62 = vpop.f32.mrf.mxu1  ;;  %v2714_v1 = vpop.f32.mrf.mxu0 }
 0x5be   :  { %v1389_v2 = vsel %vm728_vm3, %v1387_v60, -inf }
 0x5bf   :  { %1390 = vmax.xlane.f32.xlu1 %v1389_v2  ;;  %v1383_v3 = vpop.f32.mrf.mxu1 }
 0x5c0   :  { %v1388_v4 = vmul.f32 0.25, %v1383_v3 }
 0x5c1   :  { %v2719_v5 = vpop.f32.mrf.mxu1 }
 0x5c2   :  { %v1392_v6 = vsel %vm728_vm3, %v1388_v4, -inf }
 0x5c3   :  { %1393 = vmax.xlane.f32.xlu0 %v1392_v6  ;;  %v1933_v6 = vld [vmem:[#allocation11 + $0x38] sm:$0xff] }
 0x5d0   :  { %1563 = vrot.lane.b32.xlu1 %v3327_v63, %s3133_s4 }
 0x5d9   :  { %1643 = vrot.lane.b32.xlu0 %v3315_v52, %s3133_s4 }
 0x5dd   :  { %1641 = vrot.lane.b32.xlu0 %v3325_v61, %s3133_s4 }
 0x648   :  { %v1391_v8 = vpop.xlane.xlu1 %1390 }
 0x649   :  { %v1395_v9 = vsub.f32 %v1387_v60, %v1391_v8  ;;  %v1930_v8 = vld [vmem:[#allocation11 + $0x20] sm:$0xff] }
 0x64b   :  { %v1397_v10 = vmul.f32 1.442695, %v1395_v9  ;;  %v1929_v9 = vld [vmem:[#allocation11 + $0x18] sm:$0xff] }
 0x64c   :  { %v1394_v11 = vpop.xlane.xlu0 %1393  ;;  %v1564_v61 = vpop.permute.xlu1 %1563 }
 0x64d   :  { %2809 = vpow2.f32 %v1397_v10  ;;  %v1396_v12 = vsub.f32 %v1388_v4, %v1394_v11 }
 0x64f   :  { %v1399_v13 = vmul.f32 1.442695, %v1396_v12  ;;  %v1927_v12 = vld [vmem:[#allocation11 + $0x8] sm:$0xff] }
 0x650   :  { %v1644_v16 = vpop.permute.xlu0 %1643 }
 0x651   :  { %2811 = vpow2.f32 %v1399_v13  ;;  %v1926_v13 = vld [vmem:[#allocation11] sm:$0xff] }
 0x654   :  { %v1642_v63 = vpop.permute.xlu0 %1641 }
 0x65a   :  { %v2810_v14 = vpop.eup %2809 }
 0x65b   :  { %2723 = vmatmul.mubr.msk.f32.vlgmr.msra.gmra.mxu0 %vm728_vm3, %v2810_v14  ;;  %v1401_v36 = vsel %vm728_vm3, %v2810_v14, 0.0  ;;  %v2038_v14 = vld [vmem:[#allocation13 + $0x78] sm:$0xff] }
 0x65c   :  { %2731 = vmatpush3.xpose.msk.msra.mxu0 %vm573_vm1, %v1566_v7  ;;  %2732 = vmatprep.mubr.msk.f32.mxu0 %vm3131_vm2, %v3129_v15  ;;  %v1932_v7 = vld [vmem:[#allocation11 + $0x30] sm:$0xff] }
 0x65d   :  { %2740 = vmatprep.subr.mxu0 %v3129_v15 }
 0x65e   :  { %v2812_v52 = vpop.eup %2811 }
 0x65f   :  { %2728 = vmatmul.mubr.msk.f32.vlgmr.msra.gmra.mxu1 %vm728_vm3, %v2812_v52  ;;  %2733 = vmatmul.mubr.msk.f32.vlgmr.msra.gmra.mxu0 %vm573_vm1, %v1564_v61  ;;  %v1404_v34 = vsel %vm728_vm3, %v2812_v52, 0.0 }
 0x660   :  { %2736 = vmatpush3.xpose.msk.msra.mxu1 %vm573_vm1, %v1644_v16  ;;  %2737 = vmatprep.mubr.msk.f32.mxu1 %vm3131_vm2, %v3129_v15 }
 0x661   :  { %2745 = vmatprep.subr.mxu1 %v3129_v15  ;;  %2742 = vmatprep.mubr.msk.f32.mxu0 %vm3131_vm2, %v3129_v15 }
 0x663   :  { %2738 = vmatmul.mubr.msk.f32.vlgmr.msra.gmra.mxu1 %vm573_vm1, %v1642_v63 }
 0x664   :  { %2747 = vmatprep.mubr.msk.f32.mxu1 %vm3131_vm2, %v3129_v15 }
 0x71b   :  { %v3444_v17 = vpop.f32.mrf.mxu0 }
 0x71d   :  { %v2724_v18 = vpop.f32.mrf.mxu0 }
 0x71f   :  { %v1555_v21 = vpop.f32.mrf.mxu1  ;;  %v1637_v22 = vpop.f32.mrf.mxu0 }
 0x720   :  { %v1719_v24 = vmul.f32 0.25, %v1637_v22 }
 0x721   :  { %v2729_v26 = vpop.f32.mrf.mxu1  ;;  %v2734_v27 = vpop.f32.mrf.mxu0 }
 0x722   :  { %v1721_v28 = vsel %vm728_vm3, %v1719_v24, -inf }
 0x723   :  { %1722 = vmax.xlane.f32.xlu1 %v1721_v28  ;;  %v1715_v29 = vpop.f32.mrf.mxu1 }
 0x724   :  { %v1720_v30 = vmul.f32 0.25, %v1715_v29 }
 0x725   :  { %v2739_v31 = vpop.f32.mrf.mxu1 }
 0x726   :  { %v1724_v32 = vsel %vm728_vm3, %v1720_v30, -inf }
 0x727   :  { %1725 = vmax.xlane.f32.xlu0 %v1724_v32 }
 0x734   :  { %1815 = vrot.lane.b32.xlu1 %v3340_v0, %s3133_s4 }
 0x73d   :  { %1739 = vrot.lane.b32.xlu0 %v3307_v50, %s3133_s4 }
 0x758   :  { %1068 = vadd.xlane.f32.xlu1 %v1067_v33 }
 0x75c   :  { %1405 = vadd.xlane.f32.xlu1 %v1404_v34  ;;  %1071 = vadd.xlane.f32.xlu0 %v1070_v35 }
 0x760   :  { %1402 = vadd.xlane.f32.xlu0 %v1401_v36 }
 0x7ac   :  { %v1723_v37 = vpop.xlane.xlu1 %1722 }
 0x7ad   :  { %v1727_v38 = vsub.f32 %v1719_v24, %v1723_v37 }
 0x7af   :  { %v1729_v0 = vmul.f32 1.442695, %v1727_v38 }
 0x7b0   :  { %v1816_v39 = vpop.permute.xlu1 %1815  ;;  %v1726_v43 = vpop.xlane.xlu0 %1725 }
 0x7b1   :  { %2813 = vpow2.f32 %v1729_v0  ;;  %v1728_v50 = vsub.f32 %v1720_v30, %v1726_v43  ;;  %2746 = vmatpush3.msra.mxu1 %v1816_v39 }
 0x7b2   :  { %2750 = vmatprep.subr.mxu1 %v1933_v6 }
 0x7b3   :  { %v1731_v45 = vmul.f32 1.442695, %v1728_v50  ;;  %v2037_v50 = vld [vmem:[#allocation13 + $0x70] sm:$0xff] }
 0x7b4   :  { %v1740_v46 = vpop.permute.xlu0 %1739 }
 0x7b5   :  { %2815 = vpow2.f32 %v1731_v45  ;;  %2741 = vmatpush3.msra.mxu0 %v1740_v46  ;;  %v2036_v45 = vld [vmem:[#allocation13 + $0x68] sm:$0xff]  ;;  %v2035_v46 = vld [vmem:[#allocation13 + $0x60] sm:$0xff] }
 0x7be   :  { %v2814_v47 = vpop.eup %2813 }
 0x7bf   :  { %2743 = vmatmul.mubr.msk.f32.vlgmr.msra.gmra.mxu0 %vm728_vm3, %v2814_v47  ;;  %v1733_v49 = vsel %vm728_vm3, %v2814_v47, 0.0  ;;  %v2033_v47 = vld [vmem:[#allocation13 + $0x50] sm:$0xff] }
 0x7c0   :  { %1734 = vadd.xlane.f32.xlu0 %v1733_v49  ;;  %v2032_v49 = vld [vmem:[#allocation13 + $0x48] sm:$0xff] }
 0x7c2   :  { %v2816_v51 = vpop.eup %2815 }
 0x7c3   :  { %2748 = vmatmul.mubr.msk.f32.vlgmr.msra.gmra.mxu1 %vm728_vm3, %v2816_v51  ;;  %v1736_v53 = vsel %vm728_vm3, %v2816_v51, 0.0  ;;  %v2031_v51 = vld [vmem:[#allocation13 + $0x40] sm:$0xff] }
 0x7c4   :  { %742 = vadd.xlane.f32.xlu0 %v741_v48  ;;  %1737 = vadd.xlane.f32.xlu1 %v1736_v53  ;;  %v2030_v48 = vld [vmem:[#allocation13 + $0x38] sm:$0xff]  ;;  %v2029_v53 = vld [vmem:[#allocation13 + $0x30] sm:$0xff] }
 0x7c5   :  { %2751 = vmatpush3.msra.mxu1 %v1933_v6  ;;  %v2186_v6 = vld [vmem:[#allocation14 + $0xc0] sm:$0xff] }
 0x7c6   :  { %2752 = vmatprep.subr.mxu1 %v1932_v7 }
 0x7c7   :  { %2753 = vmatpush3.msra.mxu1 %v1932_v7  ;;  %v2185_v7 = vld [vmem:[#allocation14 + $0xb8] sm:$0xff] }
 0x7c8   :  { %745 = vadd.xlane.f32.xlu1 %v744_v54  ;;  %v2028_v54 = vld [vmem:[#allocation13 + $0x28] sm:$0xff] }
 0x7e1   :  { %v1069_v55 = vpop.xlane.xlu1 %1068 }
 0x7e2   :  { %2817 = vrcp.f32 %v1069_v55  ;;  %v2027_v55 = vld [vmem:[#allocation13 + $0x20] sm:$0xff] }
 0x7e5   :  { %v1406_v57 = vpop.xlane.xlu1 %1405  ;;  %v1072_v59 = vpop.xlane.xlu0 %1071 }
 0x7e6   :  { %2819 = vrcp.f32 %v1406_v57  ;;  %v2026_v57 = vld [vmem:[#allocation13 + $0x18] sm:$0xff] }
 0x7e7   :  { %2821 = vrcp.f32 %v1072_v59  ;;  %v2025_v59 = vld [vmem:[#allocation13 + $0x10] sm:$0xff] }
 0x7e9   :  { %v1403_v60 = vpop.xlane.xlu0 %1402 }
 0x7ea   :  { %2823 = vrcp.f32 %v1403_v60  ;;  %v2024_v60 = vld [vmem:[#allocation13 + $0x8] sm:$0xff] }
 0x7ef   :  { %v2818_v62 = vpop.eup %2817 }
 0x7f0   :  { %v1229_v1 = vmul.f32 %v2818_v62, %v3416_v56  ;;  %v1931_v56 = vld [vmem:[#allocation11 + $0x28] sm:$0xff]  ;;  %v2023_v62 = vld [vmem:[#allocation13] sm:$0xff] }
 0x7f1   :  { %2754 = vmatprep.subr.mxu1 %v1931_v56 }
 0x7f2   :  { %1897 = vrot.lane.b32.xlu0 %v1229_v1, %s3123_s0  ;;  %2755 = vmatpush3.msra.mxu1 %v1931_v56  ;;  %v2193_v1 = vld [vmem:[#allocation14 + $0xf8] sm:$0xff]  ;;  %v2184_v56 = vld [vmem:[#allocation14 + $0xb0] sm:$0xff] }
 0x7f3   :  { %v2820_v19 = vpop.eup %2819  ;;  %2756 = vmatprep.subr.mxu1 %v1930_v8  ;;  %2238 = vmatprep.subr.mxu0 %v2193_v1  ;;  %v2203_v1 = vld [vmem:[#allocation14 + $0x148] sm:$0xff] }
 0x7f4   :  { %v2822_v2 = vpop.eup %2821  ;;  %v1562_v3 = vmul.f32 %v2820_v19, %v1555_v21  ;;  %2757 = vmatpush3.msra.mxu1 %v1930_v8  ;;  %v2192_v19 = vld [vmem:[#allocation14 + $0xf0] sm:$0xff]  ;;  %v2183_v8 = vld [vmem:[#allocation14 + $0xa8] sm:$0xff] }
 0x7f5   :  { %v1230_v4 = vmul.f32 %v2822_v2, %v3418_v58  ;;  %v1928_v58 = vld [vmem:[#allocation11 + $0x10] sm:$0xff]  ;;  %2758 = vmatprep.subr.mxu1 %v1929_v9  ;;  %v2191_v2 = vld [vmem:[#allocation14 + $0xe8] sm:$0xff]  ;;  %2239 = vmatpush1.msra.mxu0 %v2192_v19  ;;  %v2202_v19 = vld [vmem:[#allocation14 + $0x140] sm:$0xff] }
 0x7f6   :  { %1907 = vrot.lane.b32.xlu0 %v1562_v3, %s3134_s24  ;;  %2759 = vmatpush3.msra.mxu1 %v1929_v9  ;;  %v2190_v3 = vld [vmem:[#allocation14 + $0xe0] sm:$0xff] }
 0x7f7   :  { %v2824_v20 = vpop.eup %2823  ;;  %1899 = vrot.lane.b32.xlu1 %v1230_v4, %s3123_s0  ;;  %2760 = vmatprep.subr.mxu1 %v1928_v58  ;;  %s3135_s0 = smov 48   ;;  %v2189_v4 = vld [vmem:[#allocation14 + $0xd8] sm:$0xff]  ;;  %v2182_v9 = vld [vmem:[#allocation14 + $0xa0] sm:$0xff] }
 0x7f8   :  { %v1561_v5 = vmul.f32 %v2824_v20, %v3444_v17  ;;  %2761 = vmatpush3.msra.mxu1 %v1928_v58  ;;  %2240 = vmatprep.subr.mxu0 %v2191_v2  ;;  %v2188_v20 = vld [vmem:[#allocation14 + $0xd0] sm:$0xff]  ;;  %v2181_v58 = vld [vmem:[#allocation14 + $0x98] sm:$0xff] }
 0x7f9   :  { %2762 = vmatprep.subr.mxu1 %v1927_v12  ;;  %2241 = vmatpush1.msra.mxu0 %v2190_v3  ;;  %v2201_v2 = vld [vmem:[#allocation14 + $0x138] sm:$0xff]  ;;  %v2200_v3 = vld [vmem:[#allocation14 + $0x130] sm:$0xff] }
 0x7fa   :  { %2763 = vmatpush3.msra.mxu1 %v1927_v12  ;;  %2242 = vmatprep.subr.mxu0 %v2189_v4  ;;  %v2178_v12 = vld [vmem:[#allocation14 + $0x80] sm:$0xff]  ;;  %v2199_v4 = vld [vmem:[#allocation14 + $0x128] sm:$0xff] }
 0x7fb   :  { %1905 = vrot.lane.b32.xlu1 %v1561_v5, %s3134_s24  ;;  %2764 = vmatprep.subr.mxu1 %v1926_v13  ;;  %v2187_v5 = vld [vmem:[#allocation14 + $0xc8] sm:$0xff] }
 0x7fc   :  { %2765 = vmatpush3.msra.mxu1 %v1926_v13  ;;  %2243 = vmatpush1.msra.mxu0 %v2188_v20  ;;  %v2177_v13 = vld [vmem:[#allocation14 + $0x78] sm:$0xff]  ;;  %v2198_v20 = vld [vmem:[#allocation14 + $0x120] sm:$0xff] }
 0x7fd   :  { %2073 = vmatprep.subr.mxu1 %v2038_v14  ;;  %2244 = vmatprep.subr.mxu0 %v2187_v5  ;;  %v2176_v14 = vld [vmem:[#allocation14 + $0x70] sm:$0xff]  ;;  %v2197_v5 = vld [vmem:[#allocation14 + $0x118] sm:$0xff] }
 0x7fe   :  { %2245 = vmatpush1.msra.mxu0 %v2186_v6  ;;  %v2196_v6 = vld [vmem:[#allocation14 + $0x110] sm:$0xff] }
 0x7ff   :  { %2246 = vmatprep.subr.mxu0 %v2185_v7  ;;  %v2195_v7 = vld [vmem:[#allocation14 + $0x108] sm:$0xff] }
 0x800   :  { %2247 = vmatpush1.msra.mxu0 %v2184_v56  ;;  %v2194_v56 = vld [vmem:[#allocation14 + $0x100] sm:$0xff] }
 0x801   :  { %2248 = vmatprep.subr.mxu0 %v2183_v8  ;;  %v2340_v8 = vld [vmem:[#allocation17 + $0x38] sm:$0xff] }
 0x802   :  { %2249 = vmatpush1.msra.mxu0 %v2182_v9  ;;  %v2339_v9 = vld [vmem:[#allocation17 + $0x30] sm:$0xff] }
 0x803   :  { %2250 = vmatprep.subr.mxu0 %v2181_v58  ;;  %v2338_v58 = vld [vmem:[#allocation17 + $0x28] sm:$0xff] }
 0x849   :  { %v1735_v10 = vpop.xlane.xlu0 %1734 }
 0x84a   :  { %2825 = vrcp.f32 %v1735_v10  ;;  %v2180_v10 = vld [vmem:[#allocation14 + $0x90] sm:$0xff] }
 0x84b   :  { %2251 = vmatpush1.msra.mxu0 %v2180_v10  ;;  %v2337_v10 = vld [vmem:[#allocation17 + $0x20] sm:$0xff] }
 0x84d   :  { %v1738_v11 = vpop.xlane.xlu1 %1737  ;;  %v743_v24 = vpop.xlane.xlu0 %742 }
 0x84e   :  { %2827 = vrcp.f32 %v1738_v11  ;;  %v2179_v11 = vld [vmem:[#allocation14 + $0x88] sm:$0xff] }
 0x84f   :  { %2829 = vrcp.f32 %v743_v24  ;;  %2252 = vmatprep.subr.mxu0 %v2179_v11  ;;  %v2336_v11 = vld [vmem:[#allocation17 + $0x18] sm:$0xff] }
 0x850   :  { %2253 = vmatpush1.msra.mxu0 %v2178_v12  ;;  %v2335_v12 = vld [vmem:[#allocation17 + $0x10] sm:$0xff] }
 0x851   :  { %v746_v26 = vpop.xlane.xlu1 %745  ;;  %2254 = vmatprep.subr.mxu0 %v2177_v13  ;;  %v2334_v13 = vld [vmem:[#allocation17 + $0x8] sm:$0xff] }
 0x852   :  { %2831 = vrcp.f32 %v746_v26  ;;  %2255 = vmatpush1.msra.mxu0 %v2176_v14  ;;  %v2333_v14 = vld [vmem:[#allocation17] sm:$0xff] }
 0x857   :  { %v2826_v16 = vpop.eup %2825 }
 0x85b   :  { %v2828_v17 = vpop.eup %2827 }
 0x85c   :  { %v2830_v28 = vpop.eup %2829 }
 0x85d   :  { %v895_v32 = vmul.f32 %v2830_v28, %v3375_v23  ;;  %v2169_v28 = vld [vmem:[#allocation14 + $0x38] sm:$0xff] }
 0x85f   :  { %v2832_v30 = vpop.eup %2831 }
 0x860   :  { %v896_v34 = vmul.f32 %v2832_v30, %v3377_v25  ;;  %v2034_v25 = vld [vmem:[#allocation13 + $0x58] sm:$0xff]  ;;  %v2167_v30 = vld [vmem:[#allocation14 + $0x28] sm:$0xff] }
 0x864   :  { %v1898_v29 = vpop.permute.xlu0 %1897 }
 0x865   :  { %v1919_v33 = vsel %vm573_vm1, %v895_v32, %v1898_v29  ;;  %v2168_v29 = vld [vmem:[#allocation14 + $0x30] sm:$0xff]  ;;  %v2165_v32 = vld [vmem:[#allocation14 + $0x18] sm:$0xff] }
 0x868   :  { %v1908_v35 = vpop.permute.xlu0 %1907 }
 0x869   :  { %v1900_v27 = vpop.permute.xlu1 %1899 }
 0x86a   :  { %v1920_v38 = vsel %vm573_vm1, %v896_v34, %v1900_v27  ;;  %v2163_v34 = vld [vmem:[#allocation14 + $0x8] sm:$0xff] }
 0x86b   :  { %v1922_v39 = vsel %vm203_vm0, %v1920_v38, %v1908_v35  ;;  %v2162_v35 = vld [vmem:[#allocation14] sm:$0xff]  ;;  %v2223_v38 = vld [vmem:[#allocation14 + $0x1e8] sm:$0xff] }
 0x86d   :  { %v1906_v31 = vpop.permute.xlu1 %1905 }
 0x86e   :  { %v1921_v36 = vsel %vm203_vm0, %v1919_v33, %v1906_v31  ;;  %v2166_v31 = vld [vmem:[#allocation14 + $0x20] sm:$0xff]  ;;  %v2164_v33 = vld [vmem:[#allocation14 + $0x10] sm:$0xff] }
 0x87f   :  { %v1811_v52 = vpop.f32.mrf.mxu0 }
 0x880   :  { %v1893_v61 = vmul.f32 %v2826_v16, %v1811_v52  ;;  %v2175_v16 = vld [vmem:[#allocation14 + $0x68] sm:$0xff]  ;;  %v2174_v52 = vld [vmem:[#allocation14 + $0x60] sm:$0xff] }
 0x881   :  { %v2744_v63 = vpop.f32.mrf.mxu0  ;;  %2256 = vmatprep.subr.mxu0 %v2175_v16  ;;  %v2877_v16 = vld [vmem:[#allocation2] sm:$0xff] }
 0x882   :  { %1913 = vrot.lane.b32.xlu1 %v1893_v61, %s3135_s0  ;;  %v2173_v61 = vld [vmem:[#allocation14 + $0x58] sm:$0xff]  ;;  %v2172_v63 = vld [vmem:[#allocation14 + $0x50] sm:$0xff]  ;;  %2257 = vmatpush1.msra.mxu0 %v2174_v52  ;;  %v2878_v52 = vld [vmem:[#allocation2 + $0x8] sm:$0xff] }
 0x883   :  { %v1887_v18 = vpop.f32.mrf.mxu1  ;;  %2258 = vmatprep.subr.mxu0 %v2173_v61  ;;  %v2039_v61 = vld [vmem:[%s3522_s10] sm:$0x3] }
 0x884   :  { %v1894_v21 = vmul.f32 %v2828_v17, %v1887_v18  ;;  %v2171_v17 = vld [vmem:[#allocation14 + $0x48] sm:$0xff]  ;;  %v2170_v18 = vld [vmem:[#allocation14 + $0x40] sm:$0xff]  ;;  %2259 = vmatpush1.msra.mxu0 %v2172_v63  ;;  %v2044_v63 = vrot.slane %v2039_v61, %v3295_v42 }
 0x885   :  { %v2749_v22 = vpop.f32.mrf.mxu1  ;;  %2260 = vmatprep.subr.mxu0 %v2171_v17  ;;  %v2048_v17 = vrot.slane %v2039_v61, %v3301_v44 }
 0x886   :  { %1915 = vrot.lane.b32.xlu0 %v1894_v21, %s3135_s0  ;;  %2261 = vmatpush1.msra.mxu0 %v2170_v18  ;;  %v2562_v22 = vld [vmem:[%s3520_s8] ss:$0 sm:$0xff] }
 0x887   :  { %2262 = vmatprep.subr.mxu0 %v2169_v28 }
 0x888   :  { %2263 = vmatpush1.msra.mxu0 %v2168_v29 }
 0x889   :  { %2264 = vmatprep.subr.mxu0 %v2167_v30 }
 0x88a   :  { %2265 = vmatpush1.msra.mxu0 %v2166_v31 }
 0x88b   :  { %2266 = vmatprep.subr.mxu0 %v2165_v32 }
 0x88c   :  { %2267 = vmatpush1.msra.mxu0 %v2164_v33 }
 0x88d   :  { %2268 = vmatprep.subr.mxu0 %v2163_v34 }
 0x88e   :  { %2269 = vmatpush1.msra.mxu0 %v2162_v35 }
 0x8f4   :  { %v1914_v37 = vpop.permute.xlu1 %1913 }
 0x8f5   :  { %v1924_v0 = vsel %vm1923_vm4, %v1921_v36, %v1914_v37  ;;  %v2225_v36 = vld [vmem:[#allocation14 + $0x1f8] sm:$0xff]  ;;  %v2224_v37 = vld [vmem:[#allocation14 + $0x1f0] sm:$0xff] }
 0x8f6   :  { %2766 = vmatprep.mubr.msk.f32.mxu1 %vm1941_vm5, %v1924_v0  ;;  %2270 = vmatprep.subr.mxu0 %v2225_v36  ;;  %v2222_v0 = vld [vmem:[#allocation14 + $0x1e0] sm:$0xff] }
 0x8f7   :  { %2271 = vmatpush2.msra.mxu0 %v2224_v37 }
 0x8f8   :  { %v1916_v43 = vpop.permute.xlu0 %1915  ;;  %2272 = vmatprep.subr.mxu0 %v2223_v38 }
 0x8f9   :  { %v1925_v23 = vsel %vm1923_vm4, %v1922_v39, %v1916_v43  ;;  %2273 = vmatpush2.msra.mxu0 %v2222_v0  ;;  %v2221_v39 = vld [vmem:[#allocation14 + $0x1d8] sm:$0xff]  ;;  %v2220_v43 = vld [vmem:[#allocation14 + $0x1d0] sm:$0xff] }
 0x8fa   :  { %2767 = vmatmul.mubr.msk.f32.vlgmr.msra.gmra.mxu1 %vm1941_vm5, %v1925_v23  ;;  %2274 = vmatprep.subr.mxu0 %v2221_v39  ;;  %v2218_v23 = vld [vmem:[#allocation14 + $0x1c0] sm:$0xff] }
 0x8fb   :  { %2074 = vmatpush1.msra.mxu1 %v2037_v50  ;;  %2121 = vmatprep.mubr.f32.mxu1 %v3129_v15  ;;  %v2219_v50 = vld [vmem:[#allocation14 + $0x1c8] sm:$0xff] }
 0x8fc   :  { %2075 = vmatprep.subr.mxu1 %v2036_v45  ;;  %2275 = vmatpush2.msra.mxu0 %v2220_v43  ;;  %v2217_v45 = vld [vmem:[#allocation14 + $0x1b8] sm:$0xff] }
 0x8fd   :  { %2076 = vmatpush1.msra.mxu1 %v2035_v46  ;;  %2276 = vmatprep.subr.mxu0 %v2219_v50  ;;  %v2216_v46 = vld [vmem:[#allocation14 + $0x1b0] sm:$0xff] }
 0x8fe   :  { %2077 = vmatprep.subr.mxu1 %v2034_v25  ;;  %2277 = vmatpush2.msra.mxu0 %v2218_v23  ;;  %v2215_v25 = vld [vmem:[#allocation14 + $0x1a8] sm:$0xff] }
 0x8ff   :  { %2078 = vmatpush1.msra.mxu1 %v2033_v47  ;;  %2278 = vmatprep.subr.mxu0 %v2217_v45  ;;  %v2214_v47 = vld [vmem:[#allocation14 + $0x1a0] sm:$0xff] }
 0x900   :  { %2079 = vmatprep.subr.mxu1 %v2032_v49  ;;  %2279 = vmatpush2.msra.mxu0 %v2216_v46  ;;  %v2213_v49 = vld [vmem:[#allocation14 + $0x198] sm:$0xff] }
 0x901   :  { %2080 = vmatpush1.msra.mxu1 %v2031_v51  ;;  %2280 = vmatprep.subr.mxu0 %v2215_v25  ;;  %v2212_v51 = vld [vmem:[#allocation14 + $0x190] sm:$0xff] }
 0x902   :  { %2081 = vmatprep.subr.mxu1 %v2030_v48  ;;  %2281 = vmatpush2.msra.mxu0 %v2214_v47  ;;  %v2211_v48 = vld [vmem:[#allocation14 + $0x188] sm:$0xff] }
 0x903   :  { %2082 = vmatpush1.msra.mxu1 %v2029_v53  ;;  %2282 = vmatprep.subr.mxu0 %v2213_v49  ;;  %v2210_v53 = vld [vmem:[#allocation14 + $0x180] sm:$0xff] }
 0x904   :  { %2083 = vmatprep.subr.mxu1 %v2028_v54  ;;  %2283 = vmatpush2.msra.mxu0 %v2212_v51  ;;  %v2209_v54 = vld [vmem:[#allocation14 + $0x178] sm:$0xff]  ;;  %v2226_v51 = vld [vmem:[#allocation16] sm:$0x3] }
 0x905   :  { %2084 = vmatpush1.msra.mxu1 %v2027_v55  ;;  %2284 = vmatprep.subr.mxu0 %v2211_v48  ;;  %v2208_v55 = vld [vmem:[#allocation14 + $0x170] sm:$0xff]  ;;  %v2231_v48 = vrot.slane %v2226_v51, %v3295_v42 }
 0x906   :  { %2085 = vmatprep.subr.mxu1 %v2026_v57  ;;  %2285 = vmatpush2.msra.mxu0 %v2210_v53  ;;  %v2207_v57 = vld [vmem:[#allocation14 + $0x168] sm:$0xff]  ;;  %v2235_v53 = vrot.slane %v2226_v51, %v3301_v44 }
 0x907   :  { %2086 = vmatpush1.msra.mxu1 %v2025_v59  ;;  %2286 = vmatprep.subr.mxu0 %v2209_v54  ;;  %v2206_v59 = vld [vmem:[#allocation14 + $0x160] sm:$0xff] }
 0x908   :  { %2087 = vmatprep.subr.mxu1 %v2024_v60  ;;  %2287 = vmatpush2.msra.mxu0 %v2208_v55  ;;  %v2205_v60 = vld [vmem:[#allocation14 + $0x158] sm:$0xff] }
 0x909   :  { %2088 = vmatpush1.msra.mxu1 %v2023_v62  ;;  %2288 = vmatprep.subr.mxu0 %v2207_v57  ;;  %v2204_v62 = vld [vmem:[#allocation14 + $0x150] sm:$0xff] }
 0x90a   :  { %2289 = vmatpush2.msra.mxu0 %v2206_v59  ;;  %2377 = vmatprep.subr.mxu1 %v2340_v8 }
 0x90b   :  { %2290 = vmatprep.subr.mxu0 %v2205_v60 }
 0x90c   :  { %2291 = vmatpush2.msra.mxu0 %v2204_v62 }
 0x90d   :  { %2292 = vmatprep.subr.mxu0 %v2203_v1 }
 0x90e   :  { %2293 = vmatpush2.msra.mxu0 %v2202_v19 }
 0x90f   :  { %2294 = vmatprep.subr.mxu0 %v2201_v2 }
 0x910   :  { %2295 = vmatpush2.msra.mxu0 %v2200_v3 }
 0x911   :  { %2296 = vmatprep.subr.mxu0 %v2199_v4 }
 0x912   :  { %2297 = vmatpush2.msra.mxu0 %v2198_v20  ;;  %v2341_v20 = vld [vmem:[%s3526_s14] sm:$0x3] }
 0x913   :  { %2298 = vmatprep.subr.mxu0 %v2197_v5 }
 0x914   :  { %2299 = vmatpush2.msra.mxu0 %v2196_v6  ;;  %v2346_v6 = vrot.slane %v2341_v20, %v3295_v42 }
 0x915   :  { %2300 = vmatprep.subr.mxu0 %v2195_v7  ;;  %v2350_v7 = vrot.slane %v2341_v20, %v3301_v44 }
 0x916   :  { %2301 = vmatpush2.msra.mxu0 %v2194_v56 }
 0x9ba   :  { %v2768_v21 = vpop.f32.mrf.mxu1 }
 0x9bb   :  { %v2020_v27 = vadd.f32 %v2768_v21, %v2562_v22 }
 0x9bc   :  { %v2014_v24 = vpop.f32.mrf.mxu1 }
 0x9bd   :  { %v2015_v26 = vadd.f32 %v2562_v22, %v2014_v24 }
 0x9bf   :  { %2565 = vmatmul.mubr.msk.f32.vlgmr.msra.gmra.mxu1 %vm1941_vm5, %v2015_v26 }
 0x9c0   :  { %2127 = vmatprep.mubr.f32.mxu1 %v3129_v15  ;;  %2378 = vmatpush1.msra.mxu1 %v2339_v9 }
 0x9c1   :  { %2379 = vmatprep.subr.mxu1 %v2338_v58 }
 0x9c2   :  { %2380 = vmatpush1.msra.mxu1 %v2337_v10 }
 0x9c3   :  { %2566 = vmatmul.mubr.msk.f32.gmra.mxu1 %vm1941_vm5, %v2020_v27  ;;  %2381 = vmatprep.subr.mxu1 %v2336_v11 }
 0x9c4   :  { %2417 = vmatprep.mubr.f32.mxu1 %v3129_v15  ;;  %2382 = vmatpush1.msra.mxu1 %v2335_v12 }
 0x9c5   :  { %2383 = vmatprep.subr.mxu1 %v2334_v13 }
 0x9c6   :  { %2384 = vmatpush1.msra.mxu1 %v2333_v14 }
 0x9c7   :  { %2571 = vmatmul.mubr.msk.f32.vlgmr.msra.gmra.mxu1 %vm203_vm0, %v2877_v16 }
 0x9c8   :  { %2423 = vmatprep.mubr.f32.mxu1 %v3129_v15 }
 0x9cb   :  { %2572 = vmatmul.mubr.msk.f32.gmra.mxu1 %vm203_vm0, %v2878_v52 }
 0xa7f   :  { %v2123_v18 = vpop.f32.mrf.mxu1 }
 0xa80   :  { %v2124_v21 = vadd.f32 %v2123_v18, %v2044_v63 }
 0xa81   :  { %v2125_v22 = vpop.f32.mrf.mxu1 }
 0xa82   :  { %v2567_v24 = vmul.f32 -1.442695, %v2124_v21  ;;  %v2126_v26 = vadd.f32 %v2125_v22, %v2048_v17 }
 0xa83   :  { %v2129_v27 = vpop.f32.mrf.mxu1 }
 0xa84   :  { %2833 = vpow2.f32 %v2567_v24  ;;  %v2568_v28 = vmul.f32 -1.442695, %v2126_v26  ;;  %v2130_v15 = vadd.f32 %v2129_v27, %v2044_v63 }
 0xa85   :  { %v2131_v29 = vpop.f32.mrf.mxu1 }
 0xa86   :  { %2835 = vpow2.f32 %v2568_v28  ;;  %v2569_v30 = vmul.f32 -1.442695, %v2130_v15  ;;  %v2132_v31 = vadd.f32 %v2131_v29, %v2048_v17 }
 0xa87   :  { %v2419_v4 = vpop.f32.mrf.mxu1 }
 0xa88   :  { %2837 = vpow2.f32 %v2569_v30  ;;  %v2570_v32 = vmul.f32 -1.442695, %v2132_v31  ;;  %v2420_v8 = vadd.f32 %v2419_v4, %v2346_v6 }
 0xa89   :  { %v2421_v5 = vpop.f32.mrf.mxu1 }
 0xa8a   :  { %2839 = vpow2.f32 %v2570_v32  ;;  %v2422_v9 = vadd.f32 %v2421_v5, %v2350_v7  ;;  %v2573_v10 = vmul.f32 -1.442695, %v2420_v8 }
 0xa8b   :  { %v2425_v56 = vpop.f32.mrf.mxu1 }
 0xa8c   :  { %v2426_v11 = vadd.f32 %v2425_v56, %v2346_v6  ;;  %v2574_v12 = vmul.f32 -1.442695, %v2422_v9 }
 0xa8d   :  { %v2427_v58 = vpop.f32.mrf.mxu1 }
 0xa8e   :  { %v2428_v13 = vadd.f32 %v2427_v58, %v2350_v7  ;;  %v2575_v14 = vmul.f32 -1.442695, %v2426_v11 }
 0xa90   :  { %v2576_v16 = vmul.f32 -1.442695, %v2428_v13 }
 0xa91   :  { %v2834_v33 = vpop.eup %2833 }
 0xa92   :  { %v2146_v34 = vadd.f32 1.0, %v2834_v33 }
 0xa93   :  { %v2836_v35 = vpop.eup %2835 }
 0xa94   :  { %v2147_v36 = vadd.f32 1.0, %v2836_v35  ;;  %2841 = vrcp.f32 %v2146_v34  ;;  %v2454_v35 = vld [vmem:[%s3527_s15] sm:$0x3]  ;;  %s3136_s15 = smov [#allocation19]  }
 0xa95   :  { %v2838_v37 = vpop.eup %2837  ;;  %s2513_s2 = sshll.u32 %s3136_s15, 4  ;;  %s2514_s2 = int_to_ptr.vmem [resolvable:$true] %s2513_s2 }
 0xa96   :  { %2843 = vrcp.f32 %v2147_v36  ;;  %v2148_v38 = vadd.f32 1.0, %v2838_v37  ;;  %v2459_v37 = vrot.slane %v2454_v35, %v3295_v42  ;;  %s3079_s20 = scalar_lea.vmem %s2514_s2, 32  ;;  %p3084_p9 = scmp.lt.s32.totalorder %s2514_s2, %s2514_s2 }
 0xa97   :  { %v2840_v0 = vpop.eup %2839  ;;  %p3080_p8 = scmp.ne.s32.totalorder %s2514_s2, %s3079_s20  ;;  %p3085_p10 = scmp.lt.s32.totalorder %s3079_s20, %s3079_s20 }
 0xa98   :  { %v2149_v39 = vadd.f32 1.0, %v2840_v0  ;;  %2845 = vrcp.f32 %v2148_v38  ;;  %v2463_v38 = vrot.slane %v2454_v35, %v3301_v44 }
 0xa99   :  { %p3086_p11 = por %p3085_p10, %p3084_p9 }
 0xa9a   :  { %2847 = vrcp.f32 %v2149_v39 }
 0xa9b   :  { %2849 = vpow2.f32 %v2573_v10  ;;  %p3087_p12 = pnand %p3086_p11, %p3080_p8 }
 0xa9c   :  { %2851 = vpow2.f32 %v2574_v12 }
 0xa9d   :  { %2853 = vpow2.f32 %v2575_v14 }
 0xa9e   :  { %2855 = vpow2.f32 %v2576_v16 }
 0xaa1   :  { %v2842_v43 = vpop.eup %2841 }
 0xaa2   :  { %v2158_v45 = vmul.f32 %v2842_v43, %v2124_v21 }
 0xaa3   :  { %v2844_v50 = vpop.eup %2843 }
 0xaa4   :  { %v2159_v23 = vmul.f32 %v2844_v50, %v2126_v26 }
 0xaa5   :  { %v2846_v46 = vpop.eup %2845 }
 0xaa6   :  { %2302 = vmatprep.mubr.f32.mxu0 %v2159_v23  ;;  %v2160_v49 = vmul.f32 %v2846_v46, %v2130_v15 }
 0xaa7   :  { %v2848_v25 = vpop.eup %2847  ;;  %2303 = vmatmul.mubr.f32.vlgmr.msra.gmra.mxu0 %v2158_v45 }
 0xaa8   :  { %v2161_v47 = vmul.f32 %v2848_v25, %v2132_v31  ;;  %v2850_v52 = vpop.eup %2849 }
 0xaa9   :  { %v2852_v61 = vpop.eup %2851  ;;  %v2442_v63 = vadd.f32 1.0, %v2850_v52 }
 0xaaa   :  { %2308 = vmatprep.mubr.f32.mxu0 %v2161_v47  ;;  %v2854_v17 = vpop.eup %2853  ;;  %v2443_v18 = vadd.f32 1.0, %v2852_v61 }
 0xaab   :  { %2309 = vmatmul.mubr.f32.gmra.mxu0 %v2160_v49  ;;  %v2856_v21 = vpop.eup %2855  ;;  %2857 = vrcp.f32 %v2442_v63  ;;  %v2444_v22 = vadd.f32 1.0, %v2854_v17 }
 0xaac   :  { %2859 = vrcp.f32 %v2443_v18  ;;  %v2445_v24 = vadd.f32 1.0, %v2856_v21 }
 0xaad   :  { %2861 = vrcp.f32 %v2444_v22 }
 0xaae   :  { %2863 = vrcp.f32 %v2445_v24 }
 0xab8   :  { %v2858_v36 = vpop.eup %2857 }
 0xab9   :  { %v2860_v0 = vpop.eup %2859  ;;  %v2466_v43 = vmul.f32 %v2858_v36, %v2459_v37 }
 0xaba   :  { %v2862_v39 = vpop.eup %2861  ;;  %v2467_v50 = vmul.f32 %v2860_v0, %v2463_v38 }
 0xabb   :  { %v2864_v23 = vpop.eup %2863  ;;  %v2468_v25 = vmul.f32 %v2862_v39, %v2459_v37 }
 0xb67   :  { %v2304_v54 = vpop.f32.mrf.mxu0 }
 0xb68   :  { %v2305_v57 = vadd.f32 %v2304_v54, %v2231_v48 }
 0xb69   :  { %v2306_v55 = vpop.f32.mrf.mxu0 }
 0xb6a   :  { %v2307_v59 = vadd.f32 %v2306_v55, %v2235_v53 }
 0xb6b   :  { %v2310_v60 = vpop.f32.mrf.mxu0 }
 0xb6c   :  { %v2315_v62 = vmax.f32 %v2305_v57, %v2307_v59  ;;  %v2311_v19 = vadd.f32 %v2310_v60, %v2231_v48  ;;  %v2469_v48 = vmul.f32 %v2864_v23, %v2463_v38 }
 0xb6d   :  { %v2312_v1 = vpop.f32.mrf.mxu0 }
 0xb6e   :  { %v2313_v2 = vadd.f32 %v2312_v1, %v2235_v53  ;;  %2316 = vmax.xlane.f32.xlu1 %v2315_v62  ;;  %v2493_v1 = vand.u32 127, %v313_v40 }
 0xb70   :  { %v2318_v3 = vmax.f32 %v2311_v19, %v2313_v2 }
 0xb72   :  { %2319 = vmax.xlane.f32.xlu0 %v2318_v3  ;;  %v2496_v3 = vsub.s32 %v2493_v1, %v3292_v41 }
 0xbf7   :  { %v2317_v26 = vpop.xlane.xlu1 %2316 }
 0xbf8   :  { %v2321_v27 = vsub.f32 %v2305_v57, %v2317_v26  ;;  %v2322_v28 = vsub.f32 %v2307_v59, %v2317_v26 }
 0xbfa   :  { %v2325_v15 = vmul.f32 1.442695, %v2321_v27  ;;  %v2327_v29 = vmul.f32 1.442695, %v2322_v28 }
 0xbfb   :  { %v2320_v30 = vpop.xlane.xlu0 %2319 }
 0xbfc   :  { %2865 = vpow2.f32 %v2325_v15  ;;  %v2323_v31 = vsub.f32 %v2311_v19, %v2320_v30  ;;  %v2324_v32 = vsub.f32 %v2313_v2, %v2320_v30 }
 0xbfd   :  { %2867 = vpow2.f32 %v2327_v29 }
 0xbfe   :  { %v2329_v33 = vmul.f32 1.442695, %v2323_v31  ;;  %v2331_v34 = vmul.f32 1.442695, %v2324_v32 }
 0xc00   :  { %2869 = vpow2.f32 %v2329_v33 }
 0xc01   :  { %2871 = vpow2.f32 %v2331_v34 }
 0xc09   :  { %v2866_v45 = vpop.eup %2865 }
 0xc0a   :  { %v2868_v46 = vpop.eup %2867  ;;  %v2470_v49 = vmul.f32 %v2866_v45, %v2466_v43 }
 0xc0b   :  { %v2480_v47 = vadd.f32 %v2868_v46, %v2866_v45  ;;  %v2471_v51 = vmul.f32 %v2868_v46, %v2467_v50 }
 0xc0d   :  { %v2870_v53 = vpop.eup %2869  ;;  %2481 = vadd.xlane.f32.xlu0 %v2480_v47  ;;  %v2474_v57 = vadd.f32 %v2471_v51, %v2470_v49 }
 0xc0e   :  { %v2872_v54 = vpop.eup %2871  ;;  %v2472_v42 = vmul.f32 %v2870_v53, %v2468_v25 }
 0xc0f   :  { %v2483_v55 = vadd.f32 %v2872_v54, %v2870_v53  ;;  %v2473_v59 = vmul.f32 %v2872_v54, %v2469_v48 }
 0xc11   :  { %2484 = vadd.xlane.f32.xlu1 %v2483_v55  ;;  %2475 = vadd.xlane.f32.xlu0 %v2474_v57  ;;  %v2477_v44 = vadd.f32 %v2473_v59, %v2472_v42 }
 0xc15   :  { %2478 = vadd.xlane.f32.xlu1 %v2477_v44 }
 0xc96   :  { %v2482_v60 = vpop.xlane.xlu0 %2481 }
 0xc97   :  { %2873 = vrcp.f32 %v2482_v60 }
 0xc9a   :  { %v2485_v62 = vpop.xlane.xlu1 %2484  ;;  %v2476_v2 = vpop.xlane.xlu0 %2475 }
 0xc9b   :  { %2875 = vrcp.f32 %v2485_v62 }
 0xc9e   :  { %v2479_v5 = vpop.xlane.xlu1 %2478 }
 0xca4   :  { %v2874_v19 = vpop.eup %2873 }
 0xca5   :  { %v2488_v4 = vmul.f32 %v2874_v19, %v2476_v2 }
 0xca7   :  { %v2497_v7 = vrot.slane %v2488_v4, %v2496_v3 }
 0xca8   :  { %v2876_v20 = vpop.eup %2875 }
 0xca9   :  { %v2489_v6 = vmul.f32 %v2876_v20, %v2479_v5 }
 0xcab   :  { %v2501_v56 = vrot.slane %v2489_v6, %v2496_v3 }
 0xcad   :  { %v2503_v8 = vsel %vm2502_vm6, %v2501_v56, %v2497_v7 }
 0xcae   :  { %2506 = vst.msk [vmem:[#allocation19] sm:$0x3] %vm2505_vm7, %v2503_v8 }
 0xcaf   :  { %3090 = shalt.err (!%p3087_p12)
}
 0xcb0   :  { %2516 = dma.vmem_to_hbm [thread:$0]  %s2514_s2, 32, %s3528_s16, [#allocation4]  }
 0xcb1   :  { %3111 = dma.done.wait [#allocation4], 32  }
 0xcb2   :  { %3112 = vsyncadd [#allocation4], 4294967264 }
 0xcb3   :  { %2520 = vsyncpa [#allocation3], 1 }
 0xcb4   :  { %2521 = vsyncpa [#allocation6], 1 }
 0xcb5   :  { %2522 = vsyncpa [#allocation9], 1 }
 0xcb6   :  { %2523 = vsyncpa [#allocation12], 1 }
 0xcb7   :  { %2524 = vsyncpa [#allocation15], 1 }
 0xcb8   :  { %2525 = vsyncpa [#allocation18], 1 }
 0xcb9   :  { %2526 = vsyncpa [#allocation4], 1 }

</bundles_post_ra>
